<compile_context>
chip_gen: v6e
topology: v6e:2x2x1
jax: 0.10.0
libtpu: 0.0.40
codegen_flags: <defaults>
</compile_context>

<pallas_src>
import numpy as np
import jax
import jax.numpy as jnp
from jax import lax
from jax.experimental import pallas as pl
from jax.experimental.pallas import tpu as pltpu


# --------------------------------- kernel -------------------------------------

def make_waveblock_kernel(num_layers, kernel_size, L, C_in, F, block_b,
                          compute_dtype):
    dilations = [2 ** i for i in range(num_layers)]
    K = kernel_size
    M = block_b * L
    halo = dilations[-1] * (K - 1) // 2        # max left/right pad over layers
    Lp = L + 2 * halo                          # padded sequence length (scratch)

    def kernel(x_ref, wf_ref, w_all_ref, b_all_ref, o_ref, pad_ref):
        # Consume the PyTorch (Bb, C_in, L) layout directly: one tiny in-kernel
        # transpose instead of a wrapper HBM->HBM transpose + cast pass.
        x = jnp.transpose(x_ref[...], (0, 2, 1)).reshape(M, C_in)
        x = x.astype(compute_dtype)

        # Zero the tap scratch once per invocation; only the centre
        # [halo : halo+L] is rewritten each layer, so the halos stay zero
        # (matches Conv1d padding='same' zero padding).
        pad_ref[...] = jnp.zeros_like(pad_ref)

        # first_conv: 1x1 conv == channel matmul (f32 accumulation).
        h = jnp.dot(x, wf_ref[...], preferred_element_type=jnp.float32)
        h = h + b_all_ref[0:1, :F]                       # (1, F) bias, added once
        res = h

        for li, d in enumerate(dilations):
            left = d * (K - 1) // 2
            # Stage h into the padded scratch: a single f32->bf16 cast of F
            # columns (instead of casting K*F columns of shifted copies).
            pad_ref[:, halo:halo + L, :] = (
                h.reshape(block_b, L, F).astype(compute_dtype))

            # Each tap is a plain static sublane-offset slice of the padded
            # scratch: no rolls, no boundary masks.
            lhs = jnp.concatenate(
                [pad_ref[:, halo - left + k * d: halo - left + k * d + L, :]
                     .reshape(M, F)
                 for k in range(K)],
                axis=-1)                                  # (M, K*F) bf16

            # Lazy per-layer weight load: (K*F + F, 2F).
            w_l = w_all_ref[li]
            # One wide matmul produces [tanh-branch | sigmoid-branch].
            acc = jnp.dot(lhs, w_l[:K * F, :],
                          preferred_element_type=jnp.float32)      # (M, 2F)
            acc = acc + b_all_ref[1 + li:2 + li, :]                 # (1, 2F)

            # Gating stays f32 (v5e VPU/EUP have no bf16 path).
            g = jnp.tanh(acc[:, :F]) * jax.nn.sigmoid(acc[:, F:])  # (M, F)

            # Final 1x1 conv for this layer.
            h = jnp.dot(g.astype(compute_dtype), w_l[K * F:, :F],
                        preferred_element_type=jnp.float32)
            h = h + b_all_ref[1 + num_layers + li:2 + num_layers + li, :F]
            res = res + h

        # Store (Bb, F, L): lane dim = L (lane-dense for real sequence lengths)
        # and the wrapper's output transpose disappears; bf16 store halves
        # writeback traffic.
        o_ref[...] = jnp.transpose(res.reshape(block_b, L, F),
                                   (0, 2, 1)).astype(o_ref.dtype)

    return kernel, Lp


# ------------------------------ host-side packing ------------------------------

def _pack_params(params, num_layers, kernel_size, compute_dtype):
    wf, bf, wt, bt, ws, bs, wfin, bfin = params
    C_in, F = wf.shape
    K = kernel_size

    # Gate weights: fuse tanh/sigm along output dim, fuse taps along input dim.
    w_gate = jnp.concatenate([wt, ws], axis=-1)              # (NL, K, F, 2F)
    w_gate = w_gate.reshape(num_layers, K * F, 2 * F)        # (NL, K*F, 2F)
    # Final 1x1 weights padded to 2F and stacked into the same tensor.
    w_fin_p = jnp.pad(wfin, ((0, 0), (0, 0), (0, F)))        # (NL, F, 2F)
    w_all = jnp.concatenate([w_gate, w_fin_p], axis=1)       # (NL, K*F+F, 2F)

    # All biases in one array: row 0 = first conv, rows 1..NL = [bt|bs],
    # rows 1+NL..2NL = [bfin|0].
    b_first = jnp.pad(bf[None, :], ((0, 0), (0, F)))         # (1, 2F)
    b_gate = jnp.concatenate([bt, bs], axis=-1)               # (NL, 2F)
    b_fin = jnp.pad(bfin, ((0, 0), (0, F)))                   # (NL, 2F)
    b_all = jnp.concatenate([b_first, b_gate, b_fin], axis=0)  # (1+2NL, 2F)

    return (wf.astype(compute_dtype),
            w_all.astype(compute_dtype),
            b_all.astype(jnp.float32))


# ------------------------------ block-size heuristic ---------------------------

def _choose_block_b(B, L, C_in, F, num_layers, K,
                    target_rows=2048, min_grid=4, vmem_budget=24 << 20):
    """Pick the per-step batch block.

    Priorities (perf review):
      1) keep at least min(min_grid, B) grid steps so the BlockSpec pipeline has
         iterations to overlap and v7x megacore has steps to shard;
      2) within that, grow M = block_b*L toward the MXU row target (>=256);
      3) never exceed a v7x-safe (64 MiB physical) per-step VMEM budget.
    """
    halo = (2 ** (num_layers - 1)) * (K - 1) // 2

    def vmem_bytes(bb):
        rows = bb * L
        live = rows * F * (24 + 2 * K)                 # h/res/acc/g f32 + lhs bf16
        pad = bb * (L + 2 * halo) * F * 2              # bf16 tap scratch
        blocks = 2 * rows * C_in * 4 + 2 * rows * F * 2  # double-buffered in/out
        return live + pad + blocks

    max_bb = max(1, B // min(min_grid, B))             # keep >= min(min_grid,B) steps
    best = 1
    for bb in range(1, B + 1):
        if B % bb or bb > max_bb:
            continue
        if vmem_bytes(bb) > vmem_budget:
            continue
        if bb * L <= target_rows or best * L < 256:
            best = bb
    return best


# --------------------------------- wrapper -------------------------------------

def waveblock_pallas(x_ncl, params, num_layers, kernel_size,
                     compute_dtype=jnp.bfloat16, out_dtype=jnp.bfloat16,
                     block_b=None, vmem_limit_bytes=48 * 1024 * 1024):
    """x_ncl: (B, C_in, L) float32 (PyTorch Conv1d layout). Returns (B, F, L)."""
    wf = params[0]
    B, C_in, L = x_ncl.shape
    F = wf.shape[1]
    K = kernel_size

    if block_b is None:
        block_b = _choose_block_b(B, L, C_in, F, num_layers, K)
    assert B % block_b == 0, "B must be divisible by block_b"

    wf_c, w_all, b_all = _pack_params(params, num_layers, K, compute_dtype)
    kernel, Lp = make_waveblock_kernel(num_layers, K, L, C_in, F, block_b,
                                       compute_dtype)

    def build(single_buffer_weights):
        if single_buffer_weights:
            # Grid-invariant operands: single buffer (double-buffering them just
            # doubles their VMEM footprint and per-step DMA descriptors).
            wspec = lambda shape, imap: pl.BlockSpec(
                shape, imap, pipeline_mode=pl.Buffered(1))
        else:
            wspec = lambda shape, imap: pl.BlockSpec(shape, imap)
        return pl.pallas_call(
            kernel,
            out_shape=jax.ShapeDtypeStruct((B, F, L), out_dtype),
            grid=(B // block_b,),
            in_specs=[
                pl.BlockSpec((block_b, C_in, L), lambda b: (b, 0, 0)),
                wspec((C_in, F), lambda b: (0, 0)),
                wspec((num_layers, K * F + F, 2 * F), lambda b: (0, 0, 0)),
                wspec((1 + 2 * num_layers, 2 * F), lambda b: (0, 0)),
            ],
            out_specs=pl.BlockSpec((block_b, F, L), lambda b: (b, 0, 0)),
            scratch_shapes=[pltpu.VMEM((block_b, Lp, F), compute_dtype)],
            compiler_params=pltpu.CompilerParams(
                dimension_semantics=("parallel",),
                vmem_limit_bytes=vmem_limit_bytes),
        )

    try:
        out = build(True)(x_ncl, wf_c, w_all, b_all)
    except Exception:
        # Pallas build without BlockSpec.pipeline_mode / Buffered(1) support:
        # fall back to default double-buffering of the (small) weight operands.
        out = build(False)(x_ncl, wf_c, w_all, b_all)
    return out


# ----------------------------- pure-JAX reference -----------------------------

def _conv1d_same(x_ncl, w_oik, b, dilation):
    K = w_oik.shape[2]
    total = dilation * (K - 1)
    left = total // 2
    right = total - left
    y = lax.conv_general_dilated(
        x_ncl, w_oik, window_strides=(1,), padding=[(left, right)],
        rhs_dilation=(dilation,), dimension_numbers=("NCH", "OIH", "NCH"))
    return y + b[None, :, None]


def waveblock_reference(x_ncl, params, num_layers, kernel_size):
    wf, bf, wt, bt, ws, bs, wfin, bfin = params
    w_first = jnp.transpose(wf, (1, 0))[:, :, None]          # (F, C_in, 1)
    h = _conv1d_same(x_ncl, w_first, bf, 1)
    res = h
    for li in range(num_layers):
        d = 2 ** li
        wt_oik = jnp.transpose(wt[li], (2, 1, 0))             # (O, I, K)
        ws_oik = jnp.transpose(ws[li], (2, 1, 0))
        t = jnp.tanh(_conv1d_same(h, wt_oik, bt[li], d))
        s = jax.nn.sigmoid(_conv1d_same(h, ws_oik, bs[li], d))
        g = t * s
        wfin_oik = jnp.transpose(wfin[li], (1, 0))[:, :, None]
        h = _conv1d_same(g, wfin_oik, bfin[li], 1)
        res = res + h
    return res


# --------------------------------- main ---------------------------------------

if __name__ == "__main__":
    num_layers = 3
    kernel_size = 3
    B, C_in, L, F = 2, 4, 16, 32

    key = jax.random.PRNGKey(0)
    keys = jax.random.split(key, 9)
    scale = 0.1
    # weights stored as (in, out) per tap so the kernel can do x @ W
    wf = scale * jax.random.normal(keys[0], (C_in, F), jnp.float32)
    bf = scale * jax.random.normal(keys[1], (F,), jnp.float32)
    wt = scale * jax.random.normal(keys[2], (num_layers, kernel_size, F, F), jnp.float32)
    bt = scale * jax.random.normal(keys[3], (num_layers, F), jnp.float32)
    ws = scale * jax.random.normal(keys[4], (num_layers, kernel_size, F, F), jnp.float32)
    bs = scale * jax.random.normal(keys[5], (num_layers, F), jnp.float32)
    wfin = scale * jax.random.normal(keys[6], (num_layers, F, F), jnp.float32)
    bfin = scale * jax.random.normal(keys[7], (num_layers, F), jnp.float32)
    params = (wf, bf, wt, bt, ws, bs, wfin, bfin)

    x = jax.random.normal(keys[8], (B, C_in, L), jnp.float32)   # PyTorch (B, C, L)

    out = waveblock_pallas(x, params, num_layers, kernel_size)
    out = jax.block_until_ready(out)

    ref = jax.block_until_ready(
        waveblock_reference(x, params, num_layers, kernel_size))

    # bf16 matmul operands + bf16 output store (f32 accumulation) vs f32 ref.
    out_f = np.asarray(out.astype(jnp.float32))
    ref_f = np.asarray(ref)
    if not np.allclose(out_f, ref_f, atol=3e-2, rtol=3e-2):
        raise AssertionError(
            f"mismatch: max abs err = {np.max(np.abs(out_f - ref_f))}")

    print("KERNEL_OK")
</pallas_src>

<mosaic_0001>
module attributes {stable_mosaic.version = 11 : i64} {
  func.func @kernel(%arg0: i32, %arg1: memref<1x4x16xf32, #tpu.memory_space<vmem>>, %arg2: memref<4x32xbf16, #tpu.memory_space<vmem>>, %arg3: memref<3x128x64xbf16, #tpu.memory_space<vmem>>, %arg4: memref<7x64xf32, #tpu.memory_space<vmem>>, %arg5: memref<1x32x16xbf16, #tpu.memory_space<vmem>>, %arg6: memref<1x24x32xbf16, #tpu.memory_space<vmem>>) attributes {dimension_semantics = [#tpu.dimension_semantics<parallel>], iteration_bounds = array<i64: 2>, scalar_prefetch = 0 : i64, scratch_operands = 1 : i64, tpu.core_type = #tpu.core_type<tc>, window_params = [{transform_indices = @transform_0, window_bounds = array<i64: 1, 4, 16>}, {pipeline_mode = #tpu.pipeline_mode<synchronous>, transform_indices = @transform_1, window_bounds = array<i64: 4, 32>}, {pipeline_mode = #tpu.pipeline_mode<synchronous>, transform_indices = @transform_2, window_bounds = array<i64: 3, 128, 64>}, {pipeline_mode = #tpu.pipeline_mode<synchronous>, transform_indices = @transform_3, window_bounds = array<i64: 7, 64>}, {transform_indices = @transform_4, window_bounds = array<i64: 1, 32, 16>}]} {
    %c0 = arith.constant 0 : index
    %c0_0 = arith.constant 0 : index
    %c0_1 = arith.constant 0 : index
    %0 = vector.load %arg1[%c0, %c0_0, %c0_1] : memref<1x4x16xf32, #tpu.memory_space<vmem>>, vector<1x4x16xf32>
    %1 = tpu.transpose %0, [0, 2, 1] : vector<1x4x16xf32> -> vector<1x16x4xf32>
    %2 = vector.shape_cast %1 : vector<1x16x4xf32> to vector<16x4xf32>
    %3 = arith.truncf %2 : vector<16x4xf32> to vector<16x4xbf16>
    %cst = arith.constant 0.000000e+00 : bf16
    %4 = vector.broadcast %cst : bf16 to vector<1x24x32xbf16>
    %c0_2 = arith.constant 0 : index
    %c0_3 = arith.constant 0 : index
    %c0_4 = arith.constant 0 : index
    %5 = vector.load %arg6[%c0_2, %c0_3, %c0_4] : memref<1x24x32xbf16, #tpu.memory_space<vmem>>, vector<1x24x32xbf16>
    tpu.vector_store %arg6[%c0_2, %c0_3, %c0_4], %4 {strides = array<i32>} : memref<1x24x32xbf16, #tpu.memory_space<vmem>>, vector<1x24x32xbf16>,
    %c0_5 = arith.constant 0 : index
    %c0_6 = arith.constant 0 : index
    %6 = vector.load %arg2[%c0_5, %c0_6] : memref<4x32xbf16, #tpu.memory_space<vmem>>, vector<4x32xbf16>
    %cst_7 = arith.constant dense<0.000000e+00> : vector<16x32xf32>
    %7 = tpu.matmul %3, %6, %cst_7 {dimension_numbers = #tpu.dot_dimension_numbers<[1], [0], [0], [1], [0, 0, 1, 1], [], []>} : vector<16x4xbf16>, vector<4x32xbf16>, vector<16x32xf32> -> vector<16x32xf32>
    %c0_8 = arith.constant 0 : index
    %c0_9 = arith.constant 0 : index
    %8 = vector.load %arg4[%c0_8, %c0_9] : memref<7x64xf32, #tpu.memory_space<vmem>>, vector<1x32xf32>
    %9 = vector.broadcast %8 : vector<1x32xf32> to vector<16x32xf32>
    %10 = arith.addf %7, %9 : vector<16x32xf32>
    %11 = vector.shape_cast %10 : vector<16x32xf32> to vector<1x16x32xf32>
    %12 = arith.truncf %11 : vector<1x16x32xf32> to vector<1x16x32xbf16>
    %c0_10 = arith.constant 0 : index
    %c4 = arith.constant 4 : index
    %c0_11 = arith.constant 0 : index
    %13 = vector.load %arg6[%c0_10, %c4, %c0_11] : memref<1x24x32xbf16, #tpu.memory_space<vmem>>, vector<1x16x32xbf16>
    tpu.vector_store %arg6[%c0_10, %c4, %c0_11], %12 {strides = array<i32>} : memref<1x24x32xbf16, #tpu.memory_space<vmem>>, vector<1x16x32xbf16>,
    %c0_12 = arith.constant 0 : index
    %c3 = arith.constant 3 : index
    %c0_13 = arith.constant 0 : index
    %14 = vector.load %arg6[%c0_12, %c3, %c0_13] : memref<1x24x32xbf16, #tpu.memory_space<vmem>>, vector<1x16x32xbf16>
    %15 = vector.shape_cast %14 : vector<1x16x32xbf16> to vector<16x32xbf16>
    %c0_14 = arith.constant 0 : index
    %c4_15 = arith.constant 4 : index
    %c0_16 = arith.constant 0 : index
    %16 = vector.load %arg6[%c0_14, %c4_15, %c0_16] : memref<1x24x32xbf16, #tpu.memory_space<vmem>>, vector<1x16x32xbf16>
    %17 = vector.shape_cast %16 : vector<1x16x32xbf16> to vector<16x32xbf16>
    %c0_17 = arith.constant 0 : index
    %c5 = arith.constant 5 : index
    %c0_18 = arith.constant 0 : index
    %18 = vector.load %arg6[%c0_17, %c5, %c0_18] : memref<1x24x32xbf16, #tpu.memory_space<vmem>>, vector<1x16x32xbf16>
    %19 = vector.shape_cast %18 : vector<1x16x32xbf16> to vector<16x32xbf16>
    %20 = tpu.concatenate %15, %17, %19 in 1 : vector<16x32xbf16>, vector<16x32xbf16>, vector<16x32xbf16> -> vector<16x96xbf16>
    %c0_19 = arith.constant 0 : index
    %c0_20 = arith.constant 0 : index
    %c0_21 = arith.constant 0 : index
    %21 = vector.load %arg3[%c0_19, %c0_20, %c0_21] : memref<3x128x64xbf16, #tpu.memory_space<vmem>>, vector<1x128x64xbf16>
    %22 = vector.shape_cast %21 : vector<1x128x64xbf16> to vector<128x64xbf16>
    %23 = vector.extract_strided_slice %22 {offsets = [0, 0], sizes = [96, 64], strides = [1, 1]} : vector<128x64xbf16> to vector<96x64xbf16>
    %cst_22 = arith.constant dense<0.000000e+00> : vector<16x64xf32>
    %24 = tpu.matmul %20, %23, %cst_22 {dimension_numbers = #tpu.dot_dimension_numbers<[1], [0], [0], [1], [0, 0, 1, 1], [], []>} : vector<16x96xbf16>, vector<96x64xbf16>, vector<16x64xf32> -> vector<16x64xf32>
    %c1 = arith.constant 1 : index
    %c0_23 = arith.constant 0 : index
    %25 = vector.load %arg4[%c1, %c0_23] : memref<7x64xf32, #tpu.memory_space<vmem>>, vector<1x64xf32>
    %26 = vector.broadcast %25 : vector<1x64xf32> to vector<16x64xf32>
    %27 = arith.addf %24, %26 : vector<16x64xf32>
    %28 = vector.extract_strided_slice %27 {offsets = [0, 0], sizes = [16, 32], strides = [1, 1]} : vector<16x64xf32> to vector<16x32xf32>
    %29 = math.tanh %28 : vector<16x32xf32>
    %30 = vector.extract_strided_slice %27 {offsets = [0, 32], sizes = [16, 32], strides = [1, 1]} : vector<16x64xf32> to vector<16x32xf32>
    %31 = arith.negf %30 : vector<16x32xf32>
    %32 = math.exp %31 : vector<16x32xf32>
    %cst_24 = arith.constant 1.000000e+00 : f32
    %33 = vector.broadcast %cst_24 : f32 to vector<16x32xf32>
    %34 = arith.addf %33, %32 : vector<16x32xf32>
    %35 = arith.divf %33, %34 : vector<16x32xf32>
    %36 = arith.mulf %29, %35 : vector<16x32xf32>
    %37 = arith.truncf %36 : vector<16x32xf32> to vector<16x32xbf16>
    %38 = vector.extract_strided_slice %22 {offsets = [96, 0], sizes = [32, 32], strides = [1, 1]} : vector<128x64xbf16> to vector<32x32xbf16>
    %cst_25 = arith.constant dense<0.000000e+00> : vector<16x32xf32>
    %39 = tpu.matmul %37, %38, %cst_25 {dimension_numbers = #tpu.dot_dimension_numbers<[1], [0], [0], [1], [0, 0, 1, 1], [], []>} : vector<16x32xbf16>, vector<32x32xbf16>, vector<16x32xf32> -> vector<16x32xf32>
    %c4_26 = arith.constant 4 : index
    %c0_27 = arith.constant 0 : index
    %40 = vector.load %arg4[%c4_26, %c0_27] : memref<7x64xf32, #tpu.memory_space<vmem>>, vector<1x32xf32>
    %41 = vector.broadcast %40 : vector<1x32xf32> to vector<16x32xf32>
    %42 = arith.addf %39, %41 : vector<16x32xf32>
    %43 = arith.addf %10, %42 : vector<16x32xf32>
    %44 = vector.shape_cast %42 : vector<16x32xf32> to vector<1x16x32xf32>
    %45 = arith.truncf %44 : vector<1x16x32xf32> to vector<1x16x32xbf16>
    %c0_28 = arith.constant 0 : index
    %c4_29 = arith.constant 4 : index
    %c0_30 = arith.constant 0 : index
    %46 = vector.load %arg6[%c0_28, %c4_29, %c0_30] : memref<1x24x32xbf16, #tpu.memory_space<vmem>>, vector<1x16x32xbf16>
    tpu.vector_store %arg6[%c0_28, %c4_29, %c0_30], %45 {strides = array<i32>} : memref<1x24x32xbf16, #tpu.memory_space<vmem>>, vector<1x16x32xbf16>,
    %c0_31 = arith.constant 0 : index
    %c2 = arith.constant 2 : index
    %c0_32 = arith.constant 0 : index
    %47 = vector.load %arg6[%c0_31, %c2, %c0_32] : memref<1x24x32xbf16, #tpu.memory_space<vmem>>, vector<1x16x32xbf16>
    %48 = vector.shape_cast %47 : vector<1x16x32xbf16> to vector<16x32xbf16>
    %c0_33 = arith.constant 0 : index
    %c4_34 = arith.constant 4 : index
    %c0_35 = arith.constant 0 : index
    %49 = vector.load %arg6[%c0_33, %c4_34, %c0_35] : memref<1x24x32xbf16, #tpu.memory_space<vmem>>, vector<1x16x32xbf16>
    %50 = vector.shape_cast %49 : vector<1x16x32xbf16> to vector<16x32xbf16>
    %c0_36 = arith.constant 0 : index
    %c6 = arith.constant 6 : index
    %c0_37 = arith.constant 0 : index
    %51 = vector.load %arg6[%c0_36, %c6, %c0_37] : memref<1x24x32xbf16, #tpu.memory_space<vmem>>, vector<1x16x32xbf16>
    %52 = vector.shape_cast %51 : vector<1x16x32xbf16> to vector<16x32xbf16>
    %53 = tpu.concatenate %48, %50, %52 in 1 : vector<16x32xbf16>, vector<16x32xbf16>, vector<16x32xbf16> -> vector<16x96xbf16>
    %c1_38 = arith.constant 1 : index
    %c0_39 = arith.constant 0 : index
    %c0_40 = arith.constant 0 : index
    %54 = vector.load %arg3[%c1_38, %c0_39, %c0_40] : memref<3x128x64xbf16, #tpu.memory_space<vmem>>, vector<1x128x64xbf16>
    %55 = vector.shape_cast %54 : vector<1x128x64xbf16> to vector<128x64xbf16>
    %56 = vector.extract_strided_slice %55 {offsets = [0, 0], sizes = [96, 64], strides = [1, 1]} : vector<128x64xbf16> to vector<96x64xbf16>
    %cst_41 = arith.constant dense<0.000000e+00> : vector<16x64xf32>
    %57 = tpu.matmul %53, %56, %cst_41 {dimension_numbers = #tpu.dot_dimension_numbers<[1], [0], [0], [1], [0, 0, 1, 1], [], []>} : vector<16x96xbf16>, vector<96x64xbf16>, vector<16x64xf32> -> vector<16x64xf32>
    %c2_42 = arith.constant 2 : index
    %c0_43 = arith.constant 0 : index
    %58 = vector.load %arg4[%c2_42, %c0_43] : memref<7x64xf32, #tpu.memory_space<vmem>>, vector<1x64xf32>
    %59 = vector.broadcast %58 : vector<1x64xf32> to vector<16x64xf32>
    %60 = arith.addf %57, %59 : vector<16x64xf32>
    %61 = vector.extract_strided_slice %60 {offsets = [0, 0], sizes = [16, 32], strides = [1, 1]} : vector<16x64xf32> to vector<16x32xf32>
    %62 = math.tanh %61 : vector<16x32xf32>
    %63 = vector.extract_strided_slice %60 {offsets = [0, 32], sizes = [16, 32], strides = [1, 1]} : vector<16x64xf32> to vector<16x32xf32>
    %64 = arith.negf %63 : vector<16x32xf32>
    %65 = math.exp %64 : vector<16x32xf32>
    %cst_44 = arith.constant 1.000000e+00 : f32
    %66 = vector.broadcast %cst_44 : f32 to vector<16x32xf32>
    %67 = arith.addf %66, %65 : vector<16x32xf32>
    %68 = arith.divf %66, %67 : vector<16x32xf32>
    %69 = arith.mulf %62, %68 : vector<16x32xf32>
    %70 = arith.truncf %69 : vector<16x32xf32> to vector<16x32xbf16>
    %71 = vector.extract_strided_slice %55 {offsets = [96, 0], sizes = [32, 32], strides = [1, 1]} : vector<128x64xbf16> to vector<32x32xbf16>
    %cst_45 = arith.constant dense<0.000000e+00> : vector<16x32xf32>
    %72 = tpu.matmul %70, %71, %cst_45 {dimension_numbers = #tpu.dot_dimension_numbers<[1], [0], [0], [1], [0, 0, 1, 1], [], []>} : vector<16x32xbf16>, vector<32x32xbf16>, vector<16x32xf32> -> vector<16x32xf32>
    %c5_46 = arith.constant 5 : index
    %c0_47 = arith.constant 0 : index
    %73 = vector.load %arg4[%c5_46, %c0_47] : memref<7x64xf32, #tpu.memory_space<vmem>>, vector<1x32xf32>
    %74 = vector.broadcast %73 : vector<1x32xf32> to vector<16x32xf32>
    %75 = arith.addf %72, %74 : vector<16x32xf32>
    %76 = arith.addf %43, %75 : vector<16x32xf32>
    %77 = vector.shape_cast %75 : vector<16x32xf32> to vector<1x16x32xf32>
    %78 = arith.truncf %77 : vector<1x16x32xf32> to vector<1x16x32xbf16>
    %c0_48 = arith.constant 0 : index
    %c4_49 = arith.constant 4 : index
    %c0_50 = arith.constant 0 : index
    %79 = vector.load %arg6[%c0_48, %c4_49, %c0_50] : memref<1x24x32xbf16, #tpu.memory_space<vmem>>, vector<1x16x32xbf16>
    tpu.vector_store %arg6[%c0_48, %c4_49, %c0_50], %78 {strides = array<i32>} : memref<1x24x32xbf16, #tpu.memory_space<vmem>>, vector<1x16x32xbf16>,
    %c0_51 = arith.constant 0 : index
    %c0_52 = arith.constant 0 : index
    %c0_53 = arith.constant 0 : index
    %80 = vector.load %arg6[%c0_51, %c0_52, %c0_53] : memref<1x24x32xbf16, #tpu.memory_space<vmem>>, vector<1x16x32xbf16>
    %81 = vector.shape_cast %80 : vector<1x16x32xbf16> to vector<16x32xbf16>
    %c0_54 = arith.constant 0 : index
    %c4_55 = arith.constant 4 : index
    %c0_56 = arith.constant 0 : index
    %82 = vector.load %arg6[%c0_54, %c4_55, %c0_56] : memref<1x24x32xbf16, #tpu.memory_space<vmem>>, vector<1x16x32xbf16>
    %83 = vector.shape_cast %82 : vector<1x16x32xbf16> to vector<16x32xbf16>
    %c0_57 = arith.constant 0 : index
    %c8 = arith.constant 8 : index
    %c0_58 = arith.constant 0 : index
    %84 = vector.load %arg6[%c0_57, %c8, %c0_58] : memref<1x24x32xbf16, #tpu.memory_space<vmem>>, vector<1x16x32xbf16>
    %85 = vector.shape_cast %84 : vector<1x16x32xbf16> to vector<16x32xbf16>
    %86 = tpu.concatenate %81, %83, %85 in 1 : vector<16x32xbf16>, vector<16x32xbf16>, vector<16x32xbf16> -> vector<16x96xbf16>
    %c2_59 = arith.constant 2 : index
    %c0_60 = arith.constant 0 : index
    %c0_61 = arith.constant 0 : index
    %87 = vector.load %arg3[%c2_59, %c0_60, %c0_61] : memref<3x128x64xbf16, #tpu.memory_space<vmem>>, vector<1x128x64xbf16>
    %88 = vector.shape_cast %87 : vector<1x128x64xbf16> to vector<128x64xbf16>
    %89 = vector.extract_strided_slice %88 {offsets = [0, 0], sizes = [96, 64], strides = [1, 1]} : vector<128x64xbf16> to vector<96x64xbf16>
    %cst_62 = arith.constant dense<0.000000e+00> : vector<16x64xf32>
    %90 = tpu.matmul %86, %89, %cst_62 {dimension_numbers = #tpu.dot_dimension_numbers<[1], [0], [0], [1], [0, 0, 1, 1], [], []>} : vector<16x96xbf16>, vector<96x64xbf16>, vector<16x64xf32> -> vector<16x64xf32>
    %c3_63 = arith.constant 3 : index
    %c0_64 = arith.constant 0 : index
    %91 = vector.load %arg4[%c3_63, %c0_64] : memref<7x64xf32, #tpu.memory_space<vmem>>, vector<1x64xf32>
    %92 = vector.broadcast %91 : vector<1x64xf32> to vector<16x64xf32>
    %93 = arith.addf %90, %92 : vector<16x64xf32>
    %94 = vector.extract_strided_slice %93 {offsets = [0, 0], sizes = [16, 32], strides = [1, 1]} : vector<16x64xf32> to vector<16x32xf32>
    %95 = math.tanh %94 : vector<16x32xf32>
    %96 = vector.extract_strided_slice %93 {offsets = [0, 32], sizes = [16, 32], strides = [1, 1]} : vector<16x64xf32> to vector<16x32xf32>
    %97 = arith.negf %96 : vector<16x32xf32>
    %98 = math.exp %97 : vector<16x32xf32>
    %cst_65 = arith.constant 1.000000e+00 : f32
    %99 = vector.broadcast %cst_65 : f32 to vector<16x32xf32>
    %100 = arith.addf %99, %98 : vector<16x32xf32>
    %101 = arith.divf %99, %100 : vector<16x32xf32>
    %102 = arith.mulf %95, %101 : vector<16x32xf32>
    %103 = arith.truncf %102 : vector<16x32xf32> to vector<16x32xbf16>
    %104 = vector.extract_strided_slice %88 {offsets = [96, 0], sizes = [32, 32], strides = [1, 1]} : vector<128x64xbf16> to vector<32x32xbf16>
    %cst_66 = arith.constant dense<0.000000e+00> : vector<16x32xf32>
    %105 = tpu.matmul %103, %104, %cst_66 {dimension_numbers = #tpu.dot_dimension_numbers<[1], [0], [0], [1], [0, 0, 1, 1], [], []>} : vector<16x32xbf16>, vector<32x32xbf16>, vector<16x32xf32> -> vector<16x32xf32>
    %c6_67 = arith.constant 6 : index
    %c0_68 = arith.constant 0 : index
    %106 = vector.load %arg4[%c6_67, %c0_68] : memref<7x64xf32, #tpu.memory_space<vmem>>, vector<1x32xf32>
    %107 = vector.broadcast %106 : vector<1x32xf32> to vector<16x32xf32>
    %108 = arith.addf %105, %107 : vector<16x32xf32>
    %109 = arith.addf %76, %108 : vector<16x32xf32>
    %110 = vector.shape_cast %109 : vector<16x32xf32> to vector<1x16x32xf32>
    %111 = tpu.transpose %110, [0, 2, 1] : vector<1x16x32xf32> -> vector<1x32x16xf32>
    %112 = arith.truncf %111 : vector<1x32x16xf32> to vector<1x32x16xbf16>
    %c0_69 = arith.constant 0 : index
    %c0_70 = arith.constant 0 : index
    %c0_71 = arith.constant 0 : index
    %113 = vector.load %arg5[%c0_69, %c0_70, %c0_71] : memref<1x32x16xbf16, #tpu.memory_space<vmem>>, vector<1x32x16xbf16>
    tpu.vector_store %arg5[%c0_69, %c0_70, %c0_71], %112 {strides = array<i32>} : memref<1x32x16xbf16, #tpu.memory_space<vmem>>, vector<1x32x16xbf16>,
    return
  }
  func.func @transform_0(%arg0: i32) -> (i32, i32, i32) {
    %c0_i32 = arith.constant 0 : i32
    %c0_i32_0 = arith.constant 0 : i32
    %c0_i32_1 = arith.constant 0 : i32
    return %arg0, %c0_i32, %c0_i32_0 : i32, i32, i32
  }
  func.func @transform_1(%arg0: i32) -> (i32, i32) {
    %c0_i32 = arith.constant 0 : i32
    %c0_i32_0 = arith.constant 0 : i32
    %c0_i32_1 = arith.constant 0 : i32
    return %c0_i32, %c0_i32_0 : i32, i32
  }
  func.func @transform_2(%arg0: i32) -> (i32, i32, i32) {
    %c0_i32 = arith.constant 0 : i32
    %c0_i32_0 = arith.constant 0 : i32
    %c0_i32_1 = arith.constant 0 : i32
    %c0_i32_2 = arith.constant 0 : i32
    return %c0_i32, %c0_i32_0, %c0_i32_1 : i32, i32, i32
  }
  func.func @transform_3(%arg0: i32) -> (i32, i32) {
    %c0_i32 = arith.constant 0 : i32
    %c0_i32_0 = arith.constant 0 : i32
    %c0_i32_1 = arith.constant 0 : i32
    return %c0_i32, %c0_i32_0 : i32, i32
  }
  func.func @transform_4(%arg0: i32) -> (i32, i32, i32) {
    %c0_i32 = arith.constant 0 : i32
    %c0_i32_0 = arith.constant 0 : i32
    %c0_i32_1 = arith.constant 0 : i32
    return %arg0, %c0_i32, %c0_i32_0 : i32, i32, i32
  }
}

module attributes {stable_mosaic.version = 11 : i64} {
  func.func @kernel(%arg0: i32, %arg1: memref<1x4x16xf32, #tpu.memory_space<vmem>>, %arg2: memref<4x32xbf16, #tpu.memory_space<vmem>>, %arg3: memref<3x128x64xbf16, #tpu.memory_space<vmem>>, %arg4: memref<7x64xf32, #tpu.memory_space<vmem>>, %arg5: memref<1x32x16xbf16, #tpu.memory_space<vmem>>, %arg6: memref<1x24x32xbf16, #tpu.memory_space<vmem>>) attributes {dimension_semantics = [#tpu.dimension_semantics<parallel>], iteration_bounds = array<i64: 2>, scalar_prefetch = 0 : i64, scratch_operands = 1 : i64, tpu.core_type = #tpu.core_type<tc>, window_params = [{transform_indices = @transform_0, window_bounds = array<i64: 1, 4, 16>}, {pipeline_mode = #tpu.pipeline_mode<synchronous>, transform_indices = @transform_1, window_bounds = array<i64: 4, 32>}, {pipeline_mode = #tpu.pipeline_mode<synchronous>, transform_indices = @transform_2, window_bounds = array<i64: 3, 128, 64>}, {pipeline_mode = #tpu.pipeline_mode<synchronous>, transform_indices = @transform_3, window_bounds = array<i64: 7, 64>}, {transform_indices = @transform_4, window_bounds = array<i64: 1, 32, 16>}]} {
    %c0 = arith.constant 0 : index
    %c0_0 = arith.constant 0 : index
    %c0_1 = arith.constant 0 : index
    %0 = vector.load %arg1[%c0, %c0_0, %c0_1] : memref<1x4x16xf32, #tpu.memory_space<vmem>>, vector<1x4x16xf32>
    %1 = tpu.transpose %0, [0, 2, 1] : vector<1x4x16xf32> -> vector<1x16x4xf32>
    %2 = vector.shape_cast %1 : vector<1x16x4xf32> to vector<16x4xf32>
    %3 = arith.truncf %2 : vector<16x4xf32> to vector<16x4xbf16>
    %cst = arith.constant 0.000000e+00 : bf16
    %4 = vector.broadcast %cst : bf16 to vector<1x24x32xbf16>
    %c0_2 = arith.constant 0 : index
    %c0_3 = arith.constant 0 : index
    %c0_4 = arith.constant 0 : index
    %5 = vector.load %arg6[%c0_2, %c0_3, %c0_4] : memref<1x24x32xbf16, #tpu.memory_space<vmem>>, vector<1x24x32xbf16>
    tpu.vector_store %arg6[%c0_2, %c0_3, %c0_4], %4 {strides = array<i32>} : memref<1x24x32xbf16, #tpu.memory_space<vmem>>, vector<1x24x32xbf16>,
    %c0_5 = arith.constant 0 : index
    %c0_6 = arith.constant 0 : index
    %6 = vector.load %arg2[%c0_5, %c0_6] : memref<4x32xbf16, #tpu.memory_space<vmem>>, vector<4x32xbf16>
    %cst_7 = arith.constant dense<0.000000e+00> : vector<16x32xf32>
    %7 = tpu.matmul %3, %6, %cst_7 {dimension_numbers = #tpu.dot_dimension_numbers<[1], [0], [0], [1], [0, 0, 1, 1], [], []>} : vector<16x4xbf16>, vector<4x32xbf16>, vector<16x32xf32> -> vector<16x32xf32>
    %c0_8 = arith.constant 0 : index
    %c0_9 = arith.constant 0 : index
    %8 = vector.load %arg4[%c0_8, %c0_9] : memref<7x64xf32, #tpu.memory_space<vmem>>, vector<1x32xf32>
    %9 = vector.broadcast %8 : vector<1x32xf32> to vector<16x32xf32>
    %10 = arith.addf %7, %9 : vector<16x32xf32>
    %11 = vector.shape_cast %10 : vector<16x32xf32> to vector<1x16x32xf32>
    %12 = arith.truncf %11 : vector<1x16x32xf32> to vector<1x16x32xbf16>
    %c0_10 = arith.constant 0 : index
    %c4 = arith.constant 4 : index
    %c0_11 = arith.constant 0 : index
    %13 = vector.load %arg6[%c0_10, %c4, %c0_11] : memref<1x24x32xbf16, #tpu.memory_space<vmem>>, vector<1x16x32xbf16>
    tpu.vector_store %arg6[%c0_10, %c4, %c0_11], %12 {strides = array<i32>} : memref<1x24x32xbf16, #tpu.memory_space<vmem>>, vector<1x16x32xbf16>,
    %c0_12 = arith.constant 0 : index
    %c3 = arith.constant 3 : index
    %c0_13 = arith.constant 0 : index
    %14 = vector.load %arg6[%c0_12, %c3, %c0_13] : memref<1x24x32xbf16, #tpu.memory_space<vmem>>, vector<1x16x32xbf16>
    %15 = vector.shape_cast %14 : vector<1x16x32xbf16> to vector<16x32xbf16>
    %c0_14 = arith.constant 0 : index
    %c4_15 = arith.constant 4 : index
    %c0_16 = arith.constant 0 : index
    %16 = vector.load %arg6[%c0_14, %c4_15, %c0_16] : memref<1x24x32xbf16, #tpu.memory_space<vmem>>, vector<1x16x32xbf16>
    %17 = vector.shape_cast %16 : vector<1x16x32xbf16> to vector<16x32xbf16>
    %c0_17 = arith.constant 0 : index
    %c5 = arith.constant 5 : index
    %c0_18 = arith.constant 0 : index
    %18 = vector.load %arg6[%c0_17, %c5, %c0_18] : memref<1x24x32xbf16, #tpu.memory_space<vmem>>, vector<1x16x32xbf16>
    %19 = vector.shape_cast %18 : vector<1x16x32xbf16> to vector<16x32xbf16>
    %20 = tpu.concatenate %15, %17, %19 in 1 : vector<16x32xbf16>, vector<16x32xbf16>, vector<16x32xbf16> -> vector<16x96xbf16>
    %c0_19 = arith.constant 0 : index
    %c0_20 = arith.constant 0 : index
    %c0_21 = arith.constant 0 : index
    %21 = vector.load %arg3[%c0_19, %c0_20, %c0_21] : memref<3x128x64xbf16, #tpu.memory_space<vmem>>, vector<1x128x64xbf16>
    %22 = vector.shape_cast %21 : vector<1x128x64xbf16> to vector<128x64xbf16>
    %23 = vector.extract_strided_slice %22 {offsets = [0, 0], sizes = [96, 64], strides = [1, 1]} : vector<128x64xbf16> to vector<96x64xbf16>
    %cst_22 = arith.constant dense<0.000000e+00> : vector<16x64xf32>
    %24 = tpu.matmul %20, %23, %cst_22 {dimension_numbers = #tpu.dot_dimension_numbers<[1], [0], [0], [1], [0, 0, 1, 1], [], []>} : vector<16x96xbf16>, vector<96x64xbf16>, vector<16x64xf32> -> vector<16x64xf32>
    %c1 = arith.constant 1 : index
    %c0_23 = arith.constant 0 : index
    %25 = vector.load %arg4[%c1, %c0_23] : memref<7x64xf32, #tpu.memory_space<vmem>>, vector<1x64xf32>
    %26 = vector.broadcast %25 : vector<1x64xf32> to vector<16x64xf32>
    %27 = arith.addf %24, %26 : vector<16x64xf32>
    %28 = vector.extract_strided_slice %27 {offsets = [0, 0], sizes = [16, 32], strides = [1, 1]} : vector<16x64xf32> to vector<16x32xf32>
    %29 = math.tanh %28 : vector<16x32xf32>
    %30 = vector.extract_strided_slice %27 {offsets = [0, 32], sizes = [16, 32], strides = [1, 1]} : vector<16x64xf32> to vector<16x32xf32>
    %31 = arith.negf %30 : vector<16x32xf32>
    %32 = math.exp %31 : vector<16x32xf32>
    %cst_24 = arith.constant 1.000000e+00 : f32
    %33 = vector.broadcast %cst_24 : f32 to vector<16x32xf32>
    %34 = arith.addf %33, %32 : vector<16x32xf32>
    %35 = arith.divf %33, %34 : vector<16x32xf32>
    %36 = arith.mulf %29, %35 : vector<16x32xf32>
    %37 = arith.truncf %36 : vector<16x32xf32> to vector<16x32xbf16>
    %38 = vector.extract_strided_slice %22 {offsets = [96, 0], sizes = [32, 32], strides = [1, 1]} : vector<128x64xbf16> to vector<32x32xbf16>
    %cst_25 = arith.constant dense<0.000000e+00> : vector<16x32xf32>
    %39 = tpu.matmul %37, %38, %cst_25 {dimension_numbers = #tpu.dot_dimension_numbers<[1], [0], [0], [1], [0, 0, 1, 1], [], []>} : vector<16x32xbf16>, vector<32x32xbf16>, vector<16x32xf32> -> vector<16x32xf32>
    %c4_26 = arith.constant 4 : index
    %c0_27 = arith.constant 0 : index
    %40 = vector.load %arg4[%c4_26, %c0_27] : memref<7x64xf32, #tpu.memory_space<vmem>>, vector<1x32xf32>
    %41 = vector.broadcast %40 : vector<1x32xf32> to vector<16x32xf32>
    %42 = arith.addf %39, %41 : vector<16x32xf32>
    %43 = arith.addf %10, %42 : vector<16x32xf32>
    %44 = vector.shape_cast %42 : vector<16x32xf32> to vector<1x16x32xf32>
    %45 = arith.truncf %44 : vector<1x16x32xf32> to vector<1x16x32xbf16>
    %c0_28 = arith.constant 0 : index
    %c4_29 = arith.constant 4 : index
    %c0_30 = arith.constant 0 : index
    %46 = vector.load %arg6[%c0_28, %c4_29, %c0_30] : memref<1x24x32xbf16, #tpu.memory_space<vmem>>, vector<1x16x32xbf16>
    tpu.vector_store %arg6[%c0_28, %c4_29, %c0_30], %45 {strides = array<i32>} : memref<1x24x32xbf16, #tpu.memory_space<vmem>>, vector<1x16x32xbf16>,
    %c0_31 = arith.constant 0 : index
    %c2 = arith.constant 2 : index
    %c0_32 = arith.constant 0 : index
    %47 = vector.load %arg6[%c0_31, %c2, %c0_32] : memref<1x24x32xbf16, #tpu.memory_space<vmem>>, vector<1x16x32xbf16>
    %48 = vector.shape_cast %47 : vector<1x16x32xbf16> to vector<16x32xbf16>
    %c0_33 = arith.constant 0 : index
    %c4_34 = arith.constant 4 : index
    %c0_35 = arith.constant 0 : index
    %49 = vector.load %arg6[%c0_33, %c4_34, %c0_35] : memref<1x24x32xbf16, #tpu.memory_space<vmem>>, vector<1x16x32xbf16>
    %50 = vector.shape_cast %49 : vector<1x16x32xbf16> to vector<16x32xbf16>
    %c0_36 = arith.constant 0 : index
    %c6 = arith.constant 6 : index
    %c0_37 = arith.constant 0 : index
    %51 = vector.load %arg6[%c0_36, %c6, %c0_37] : memref<1x24x32xbf16, #tpu.memory_space<vmem>>, vector<1x16x32xbf16>
    %52 = vector.shape_cast %51 : vector<1x16x32xbf16> to vector<16x32xbf16>
    %53 = tpu.concatenate %48, %50, %52 in 1 : vector<16x32xbf16>, vector<16x32xbf16>, vector<16x32xbf16> -> vector<16x96xbf16>
    %c1_38 = arith.constant 1 : index
    %c0_39 = arith.constant 0 : index
    %c0_40 = arith.constant 0 : index
    %54 = vector.load %arg3[%c1_38, %c0_39, %c0_40] : memref<3x128x64xbf16, #tpu.memory_space<vmem>>, vector<1x128x64xbf16>
    %55 = vector.shape_cast %54 : vector<1x128x64xbf16> to vector<128x64xbf16>
    %56 = vector.extract_strided_slice %55 {offsets = [0, 0], sizes = [96, 64], strides = [1, 1]} : vector<128x64xbf16> to vector<96x64xbf16>
    %cst_41 = arith.constant dense<0.000000e+00> : vector<16x64xf32>
    %57 = tpu.matmul %53, %56, %cst_41 {dimension_numbers = #tpu.dot_dimension_numbers<[1], [0], [0], [1], [0, 0, 1, 1], [], []>} : vector<16x96xbf16>, vector<96x64xbf16>, vector<16x64xf32> -> vector<16x64xf32>
    %c2_42 = arith.constant 2 : index
    %c0_43 = arith.constant 0 : index
    %58 = vector.load %arg4[%c2_42, %c0_43] : memref<7x64xf32, #tpu.memory_space<vmem>>, vector<1x64xf32>
    %59 = vector.broadcast %58 : vector<1x64xf32> to vector<16x64xf32>
    %60 = arith.addf %57, %59 : vector<16x64xf32>
    %61 = vector.extract_strided_slice %60 {offsets = [0, 0], sizes = [16, 32], strides = [1, 1]} : vector<16x64xf32> to vector<16x32xf32>
    %62 = math.tanh %61 : vector<16x32xf32>
    %63 = vector.extract_strided_slice %60 {offsets = [0, 32], sizes = [16, 32], strides = [1, 1]} : vector<16x64xf32> to vector<16x32xf32>
    %64 = arith.negf %63 : vector<16x32xf32>
    %65 = math.exp %64 : vector<16x32xf32>
    %cst_44 = arith.constant 1.000000e+00 : f32
    %66 = vector.broadcast %cst_44 : f32 to vector<16x32xf32>
    %67 = arith.addf %66, %65 : vector<16x32xf32>
    %68 = arith.divf %66, %67 : vector<16x32xf32>
    %69 = arith.mulf %62, %68 : vector<16x32xf32>
    %70 = arith.truncf %69 : vector<16x32xf32> to vector<16x32xbf16>
    %71 = vector.extract_strided_slice %55 {offsets = [96, 0], sizes = [32, 32], strides = [1, 1]} : vector<128x64xbf16> to vector<32x32xbf16>
    %cst_45 = arith.constant dense<0.000000e+00> : vector<16x32xf32>
    %72 = tpu.matmul %70, %71, %cst_45 {dimension_numbers = #tpu.dot_dimension_numbers<[1], [0], [0], [1], [0, 0, 1, 1], [], []>} : vector<16x32xbf16>, vector<32x32xbf16>, vector<16x32xf32> -> vector<16x32xf32>
    %c5_46 = arith.constant 5 : index
    %c0_47 = arith.constant 0 : index
    %73 = vector.load %arg4[%c5_46, %c0_47] : memref<7x64xf32, #tpu.memory_space<vmem>>, vector<1x32xf32>
    %74 = vector.broadcast %73 : vector<1x32xf32> to vector<16x32xf32>
    %75 = arith.addf %72, %74 : vector<16x32xf32>
    %76 = arith.addf %43, %75 : vector<16x32xf32>
    %77 = vector.shape_cast %75 : vector<16x32xf32> to vector<1x16x32xf32>
    %78 = arith.truncf %77 : vector<1x16x32xf32> to vector<1x16x32xbf16>
    %c0_48 = arith.constant 0 : index
    %c4_49 = arith.constant 4 : index
    %c0_50 = arith.constant 0 : index
    %79 = vector.load %arg6[%c0_48, %c4_49, %c0_50] : memref<1x24x32xbf16, #tpu.memory_space<vmem>>, vector<1x16x32xbf16>
    tpu.vector_store %arg6[%c0_48, %c4_49, %c0_50], %78 {strides = array<i32>} : memref<1x24x32xbf16, #tpu.memory_space<vmem>>, vector<1x16x32xbf16>,
    %c0_51 = arith.constant 0 : index
    %c0_52 = arith.constant 0 : index
    %c0_53 = arith.constant 0 : index
    %80 = vector.load %arg6[%c0_51, %c0_52, %c0_53] : memref<1x24x32xbf16, #tpu.memory_space<vmem>>, vector<1x16x32xbf16>
    %81 = vector.shape_cast %80 : vector<1x16x32xbf16> to vector<16x32xbf16>
    %c0_54 = arith.constant 0 : index
    %c4_55 = arith.constant 4 : index
    %c0_56 = arith.constant 0 : index
    %82 = vector.load %arg6[%c0_54, %c4_55, %c0_56] : memref<1x24x32xbf16, #tpu.memory_space<vmem>>, vector<1x16x32xbf16>
    %83 = vector.shape_cast %82 : vector<1x16x32xbf16> to vector<16x32xbf16>
    %c0_57 = arith.constant 0 : index
    %c8 = arith.constant 8 : index
    %c0_58 = arith.constant 0 : index
    %84 = vector.load %arg6[%c0_57, %c8, %c0_58] : memref<1x24x32xbf16, #tpu.memory_space<vmem>>, vector<1x16x32xbf16>
    %85 = vector.shape_cast %84 : vector<1x16x32xbf16> to vector<16x32xbf16>
    %86 = tpu.concatenate %81, %83, %85 in 1 : vector<16x32xbf16>, vector<16x32xbf16>, vector<16x32xbf16> -> vector<16x96xbf16>
    %c2_59 = arith.constant 2 : index
    %c0_60 = arith.constant 0 : index
    %c0_61 = arith.constant 0 : index
    %87 = vector.load %arg3[%c2_59, %c0_60, %c0_61] : memref<3x128x64xbf16, #tpu.memory_space<vmem>>, vector<1x128x64xbf16>
    %88 = vector.shape_cast %87 : vector<1x128x64xbf16> to vector<128x64xbf16>
    %89 = vector.extract_strided_slice %88 {offsets = [0, 0], sizes = [96, 64], strides = [1, 1]} : vector<128x64xbf16> to vector<96x64xbf16>
    %cst_62 = arith.constant dense<0.000000e+00> : vector<16x64xf32>
    %90 = tpu.matmul %86, %89, %cst_62 {dimension_numbers = #tpu.dot_dimension_numbers<[1], [0], [0], [1], [0, 0, 1, 1], [], []>} : vector<16x96xbf16>, vector<96x64xbf16>, vector<16x64xf32> -> vector<16x64xf32>
    %c3_63 = arith.constant 3 : index
    %c0_64 = arith.constant 0 : index
    %91 = vector.load %arg4[%c3_63, %c0_64] : memref<7x64xf32, #tpu.memory_space<vmem>>, vector<1x64xf32>
    %92 = vector.broadcast %91 : vector<1x64xf32> to vector<16x64xf32>
    %93 = arith.addf %90, %92 : vector<16x64xf32>
    %94 = vector.extract_strided_slice %93 {offsets = [0, 0], sizes = [16, 32], strides = [1, 1]} : vector<16x64xf32> to vector<16x32xf32>
    %95 = math.tanh %94 : vector<16x32xf32>
    %96 = vector.extract_strided_slice %93 {offsets = [0, 32], sizes = [16, 32], strides = [1, 1]} : vector<16x64xf32> to vector<16x32xf32>
    %97 = arith.negf %96 : vector<16x32xf32>
    %98 = math.exp %97 : vector<16x32xf32>
    %cst_65 = arith.constant 1.000000e+00 : f32
    %99 = vector.broadcast %cst_65 : f32 to vector<16x32xf32>
    %100 = arith.addf %99, %98 : vector<16x32xf32>
    %101 = arith.divf %99, %100 : vector<16x32xf32>
    %102 = arith.mulf %95, %101 : vector<16x32xf32>
    %103 = arith.truncf %102 : vector<16x32xf32> to vector<16x32xbf16>
    %104 = vector.extract_strided_slice %88 {offsets = [96, 0], sizes = [32, 32], strides = [1, 1]} : vector<128x64xbf16> to vector<32x32xbf16>
    %cst_66 = arith.constant dense<0.000000e+00> : vector<16x32xf32>
    %105 = tpu.matmul %103, %104, %cst_66 {dimension_numbers = #tpu.dot_dimension_numbers<[1], [0], [0], [1], [0, 0, 1, 1], [], []>} : vector<16x32xbf16>, vector<32x32xbf16>, vector<16x32xf32> -> vector<16x32xf32>
    %c6_67 = arith.constant 6 : index
    %c0_68 = arith.constant 0 : index
    %106 = vector.load %arg4[%c6_67, %c0_68] : memref<7x64xf32, #tpu.memory_space<vmem>>, vector<1x32xf32>
    %107 = vector.broadcast %106 : vector<1x32xf32> to vector<16x32xf32>
    %108 = arith.addf %105, %107 : vector<16x32xf32>
    %109 = arith.addf %76, %108 : vector<16x32xf32>
    %110 = vector.shape_cast %109 : vector<16x32xf32> to vector<1x16x32xf32>
    %111 = tpu.transpose %110, [0, 2, 1] : vector<1x16x32xf32> -> vector<1x32x16xf32>
    %112 = arith.truncf %111 : vector<1x32x16xf32> to vector<1x32x16xbf16>
    %c0_69 = arith.constant 0 : index
    %c0_70 = arith.constant 0 : index
    %c0_71 = arith.constant 0 : index
    %113 = vector.load %arg5[%c0_69, %c0_70, %c0_71] : memref<1x32x16xbf16, #tpu.memory_space<vmem>>, vector<1x32x16xbf16>
    tpu.vector_store %arg5[%c0_69, %c0_70, %c0_71], %112 {strides = array<i32>} : memref<1x32x16xbf16, #tpu.memory_space<vmem>>, vector<1x32x16xbf16>,
    return
  }
  func.func @transform_0(%arg0: i32) -> (i32, i32, i32) {
    %c0_i32 = arith.constant 0 : i32
    %c0_i32_0 = arith.constant 0 : i32
    %c0_i32_1 = arith.constant 0 : i32
    return %arg0, %c0_i32, %c0_i32_0 : i32, i32, i32
  }
  func.func @transform_1(%arg0: i32) -> (i32, i32) {
    %c0_i32 = arith.constant 0 : i32
    %c0_i32_0 = arith.constant 0 : i32
    %c0_i32_1 = arith.constant 0 : i32
    return %c0_i32, %c0_i32_0 : i32, i32
  }
  func.func @transform_2(%arg0: i32) -> (i32, i32, i32) {
    %c0_i32 = arith.constant 0 : i32
    %c0_i32_0 = arith.constant 0 : i32
    %c0_i32_1 = arith.constant 0 : i32
    %c0_i32_2 = arith.constant 0 : i32
    return %c0_i32, %c0_i32_0, %c0_i32_1 : i32, i32, i32
  }
  func.func @transform_3(%arg0: i32) -> (i32, i32) {
    %c0_i32 = arith.constant 0 : i32
    %c0_i32_0 = arith.constant 0 : i32
    %c0_i32_1 = arith.constant 0 : i32
    return %c0_i32, %c0_i32_0 : i32, i32
  }
  func.func @transform_4(%arg0: i32) -> (i32, i32, i32) {
    %c0_i32 = arith.constant 0 : i32
    %c0_i32_0 = arith.constant 0 : i32
    %c0_i32_1 = arith.constant 0 : i32
    return %arg0, %c0_i32, %c0_i32_0 : i32, i32, i32
  }
}

</mosaic_0001>

<bundles_post_ra>
// kernel: tpu_custom_call.1
= control target key start
LH: loop header
LB: loop body
LE: loop exit
PB: predicated region body
PF: predicated region fallthrough
CT: control target
= control target key end

     0   :  { %s1542_s15 = smov 0   ;;  %s1785_s0 = inlined_call_operand.vmem [shape: f32[2,4,16], index: 0, kind: input, shape index: {}]   ;;  %s1786_s1 = inlined_call_operand.vmem [shape: bf16[4,32], index: 1, kind: input, shape index: {}]   ;;  %s1787_s2 = inlined_call_operand.vmem [shape: bf16[3,128,64], index: 2, kind: input, shape index: {}]   ;;  %s1788_s3 = inlined_call_operand.vmem [shape: f32[7,64], index: 3, kind: input, shape index: {}]   ;;  %s1789_s4 = inlined_call_operand.vmem [shape: bf16[2,32,16], index: 4, kind: output, shape index: {}]  }
   0x1 LB: > { %s1184_s16 = sadd.s32 4294967295, %s1509_s15   ;;  %p1188_p0 = scmp.ge.s32.totalorder %s1509_s15, 1  ;;  %s1509_s15 = sphi %s1542_s15, %s14_s15  }
   0x2   : > { %p161_p1 = scmp.lt.s32.totalorder %s1509_s15, 3 }
   0x4   : > { %p162_p2 = pnand %p1188_p0, %p161_p1 }
   0x5   : > { %p186_p3 = scmp.lt.s32.totalorder (!%p162_p2), %s1184_s16, 1  ;;  %s1514_s11 = smov (!%p162_p2), 64  }
   0x6   : > { %165 = sbr.rel (%p162_p2) target bundleno = 2564 (0xa04), region = 36  ;;  %s1515_s12 = smov (!%p162_p2), 32  }
   0x7   : > { %s1516_s21 = smov (!%p162_p2), 96  }
   0xb   : > { %s1793_s16 = smov (!%p186_p3, %s1184_s16), 1  ;;  %v234_v0 = vld [vmem:[%s1786_s1] sm:$0x3]  ;;  %vm244_vm0 = vcmask 1041408   ;;  %v1511_v1 = vmov 0.0   ;;  %vm1512_vm1 = vmmov 0  }
   0xc   : > { %s1189_s19 = sshll.u32 %s1793_s16, 2  ;;  %1337 = vmatprep.subr.bf16.mxu0 %v1511_v1  ;;  %v246_v2 = vsel %vm244_vm0, %v234_v0, 0  ;;  %1343 = vmatprep.subr.bf16.mxu1 %v1511_v1  ;;  %vm230_vm2 = vcmask 257024   ;;  %v1513_v4 = vmov 0   ;;  %vm240_vm3 = vcmask 31744   ;;  %v1432_v8 = vld [vmem:[%s1787_s2 + $0x28] sm:$0xff]  }
   0xd   : > { %s189_s22 = scalar_lea.vmem %s1785_s0, %s1189_s19  ;;  %1338 = vmatpush3.bf16.msra.mxu0 %v246_v2  ;;  %1339 = vmatprep.mubr.msk.bf16.mxu0 %vm1512_vm1, %v1511_v1  ;;  %231 = vst.msk [vmem:[#allocation2] sm:$0xf] %vm230_vm2, %v1513_v4  ;;  %232 = vst.msk [vmem:[#allocation2 + $0x4] sm:$0xf] %vm230_vm2, %v1513_v4  ;;  %v1433_v9 = vld [vmem:[%s1787_s2 + $0x20] sm:$0xff]   ;;  %vm306_vm4 = vcmask 257026  }
   0xe   : > { %v196_v3 = vld [vmem:[%s189_s22] sm:$0xf]  ;;  %1359 = vmatprep.subr.bf16.mxu0 %v1511_v1  ;;  %1355 = vmatprep.mubr.msk.bf16.mxu1 %vm1512_vm1, %v1511_v1  ;;  %233 = vst.msk [vmem:[#allocation2 + $0x8] sm:$0xf] %vm230_vm2, %v1513_v4  ;;  %vm296_vm5 = vcmask 1045508   ;;  %vm309_vm7 = vcmask 254976  }
   0xf   : > { %197 = vxpose.xlu0.b32.start.end [1/1] (short) (narrow) %v196_v3, 16  ;;  %1344 = vmatpush3.bf16.msra.mxu1 %v1432_v8  ;;  %v1192_v10 = vld [vmem:[%s1788_s3] ss:$0 sm:$0xff]  ;;  %vm1593_vm6 = vmor %vm244_vm0, %vm296_vm5  ;;  %v1434_v25 = vld [vmem:[%s1787_s2 + $0x18] sm:$0xff]   ;;  %vm350_vm8 = vcmask 1046528   ;;  %vm358_vm10 = vcmask 261120  }
  0x10   : > { %1345 = vmatprep.subr.bf16.mxu1 %v1511_v1  ;;  %v1436_v26 = vld [vmem:[%s1787_s2 + $0x10] sm:$0xff]   ;;  %v1437_v31 = vld [vmem:[%s1787_s2 + $0x8] sm:$0xff]   ;;  %v1438_v40 = vld [vmem:[%s1787_s2] sm:$0xff]   ;;  %vm327_vm9 = vsmask.f32 7424  ;;  %vm364_vm11 = vcmask 523264  }
  0x11   : > { %vm390_vm12 = vsmask.f32 6400  ;;  %vm442_vm13 = vcmask 785408   ;;  %v1200_v4 = vld [vmem:[%s1788_s3 + $0x1] ss:$0 sm:$0xff]  ;;  %vm626_vm14 = vcmask 1045504  }
  0x12   : > { %vm1124_vm15 = vcmask 125952  }
  0x13   : > { %1346 = vmatpush3.bf16.msra.mxu1 %v1433_v9 }
  0x14   : > { %1347 = vmatprep.subr.bf16.mxu1 %v1511_v1 }
  0x17   : > { %1348 = vmatpush3.bf16.msra.mxu1 %v1434_v25 }
  0x18   : > { %1349 = vmatprep.subr.bf16.mxu1 %v1511_v1 }
  0x1b   : > { %1350 = vmatpush3.bf16.msra.mxu1 %v1436_v26 }
  0x1c   : > { %1351 = vmatprep.subr.bf16.mxu1 %v1511_v1 }
  0x1f   : > { %1352 = vmatpush3.bf16.msra.mxu1 %v1437_v31  ;;  %v1445_v31 = vld [vmem:[%s1787_s2 + $0x68] sm:$0xff]  }
  0x20   : > { %1353 = vmatprep.subr.bf16.mxu1 %v1511_v1 }
  0x23   : > { %1354 = vmatpush3.bf16.msra.mxu1 %v1438_v40 }
  0x24   : > { %1391 = vmatprep.subr.bf16.mxu1 %v1511_v1 }
  0x8b   : > { %v213_v5 = vpop.trf.xlu0 }
  0x8f   : > { %v214_v6 = vpop.trf.xlu0 }
  0x90   : > { %v229_v7 = vpack.c.bf16 %v214_v6, %v213_v5 }
  0x92   : > { %1340 = vmatmul.mubr.msk.bf16.vlgmr.msra.gmra.mxu0 %vm240_vm3, %v229_v7 }
  0x93   : > { %1363 = vmatprep.mubr.msk.bf16.mxu0 %vm1512_vm1, %v1511_v1 }
 0x152   : > { %v282_v11 = vpop.f32.mrf.mxu0 }
 0x153   : > { %v1583_v12 = vadd.f32 %v1192_v10, %v282_v11 }
 0x154   : > { %v1341_v13 = vpop.f32.mrf.mxu0 }
 0x155   : > { %v1295_v14 = vpack.c.bf16 %v1583_v12, %v1583_v12 }
 0x156   : > { %v285_v15 = vpop.f32.mrf.mxu0 }
 0x157   : > { %v298_v16 = vrot.slane %v1295_v14, 6  ;;  %v1587_v17 = vadd.f32 %v1192_v10, %v285_v15 }
 0x158   : > { %v1342_v18 = vpop.f32.mrf.mxu0 }
 0x159   : > { %307 = vst.msk [vmem:[#allocation2] sm:$0xc] %vm306_vm4, %v298_v16  ;;  %v1296_v19 = vpack.c.bf16 %v1587_v17, %v1587_v17  ;;  %v299_v21 = vrot.slane %v298_v16, 4  ;;  %v1439_v18 = vld [vmem:[%s1787_s2 + $0x38] sm:$0xff]  }
 0x15a   : > { %1360 = vmatpush3.bf16.msra.mxu0 %v1439_v18 }
 0x15b   : > { %v300_v22 = vrot.slane %v1296_v19, 6  ;;  %1361 = vmatprep.subr.bf16.mxu0 %v1511_v1 }
 0x15d   : > { %v301_v23 = vsel %vm1593_vm6, %v299_v21, %v300_v22  ;;  %v302_v24 = vrot.slane %v300_v22, 4  ;;  %v1440_v21 = vld [vmem:[%s1787_s2 + $0x30] sm:$0xff]  }
 0x15e   : > { %308 = vst.msk [vmem:[#allocation2 + $0x4] sm:$0xf] %vm230_vm2, %v301_v23  ;;  %1362 = vmatpush3.bf16.msra.mxu0 %v1440_v21 }
 0x15f   : > { %310 = vst.msk [vmem:[#allocation2 + $0x8] sm:$0x3] %vm309_vm7, %v302_v24  ;;  %1367 = vmatprep.subr.bf16.mxu0 %v1511_v1 }
 0x160   : > { %v314_v28 = vld [vmem:[#allocation2] sm:$0xc] }
 0x161   : > { %v311_v47 = vld [vmem:[#allocation2] sm:$0xe] }
 0x165   : > { %v312_v27 = vld [vmem:[#allocation2 + $0x4] sm:$0xf] }
 0x166   : > { %v1198_v29 = vcombine.low %v314_v28, %v312_v27  ;;  %v1430_v30 = vld [vmem:[#allocation2 + $0x8] ss:$0 sps:$4 sm:$0x77]   ;;  %v1196_v48 = vcombine.low %v311_v47, %v312_v27  ;;  %v1448_v47 = vld [vmem:[%s1787_s2 + $0x58] sm:$0xff]  }
 0x167   : > { %v1431_v32 = vld [vmem:[#allocation2 + $0x8] ss:$0 sps:$4 sm:$0x33]   ;;  %v352_v34 = vrot.slane %v1430_v30, 1 }
 0x168   : > { %v351_v33 = vrot.slane %v1198_v29, 1  ;;  %v331_v35 = vshll.u32 %v1198_v29, 16  ;;  %v336_v36 = vshll.u32 %v1431_v32, 16  ;;  %v329_v38 = vshrl.u32 %v1198_v29, 16 }
 0x169   : > { %v340_v42 = vshrl.u32 %v1431_v32, 16 }
 0x16a   : > { %v353_v37 = vsel %vm350_vm8, %v351_v33, %v352_v34  ;;  %v333_v39 = vrot.slane %v331_v35, 1  ;;  %v338_v41 = vrot.slane %v336_v36, 1  ;;  %v1210_v33 = vld [vmem:[%s1788_s3 + $0x4] ss:$0 sm:$0xff] }
 0x16b   : > { %354 = vrot.lane.b32.xlu1 %v353_v37, %s1514_s11 }
 0x16c   : > { %v334_v43 = vor.u32 %v333_v39, %v329_v38  ;;  %v342_v44 = vor.u32 %v340_v42, %v338_v41 }
 0x16e   : > { %v339_v45 = vsel %vm327_vm9, %v334_v43, %v338_v41 }
 0x16f   : > { %343 = vrot.lane.b32.xlu0 %v339_v45, %s1515_s12  ;;  %345 = vrot.lane.b32.xlu1 %v342_v44, %s1515_s12 }
 0x173   : > { %356 = vrot.lane.b32.xlu1 %v352_v34, %s1514_s11 }
 0x1dd   : > { %v355_v46 = vpop.permute.xlu1 %354 }
 0x1e1   : > { %v344_v49 = vpop.permute.xlu0 %343  ;;  %v346_v50 = vpop.permute.xlu1 %345 }
 0x1e2   : > { %v361_v51 = vsel %vm358_vm10, %v1196_v48, %v344_v49  ;;  %v363_v55 = vsel %vm358_vm10, %v1431_v32, %v346_v50  ;;  %v1446_v32 = vld [vmem:[%s1787_s2 + $0x60] sm:$0xff]   ;;  %v1450_v48 = vld [vmem:[%s1787_s2 + $0x50] sm:$0xff]  }
 0x1e3   : > { %v366_v52 = vsel %vm364_vm11, %v361_v51, %v355_v46 }
 0x1e4   : > { %v391_v53 = vshrl.u32 %v366_v52, 16  ;;  %v394_v54 = vshll.u32 %v366_v52, 16 }
 0x1e5   : > { %v357_v56 = vpop.permute.xlu1 %356 }
 0x1e6   : > { %v368_v57 = vsel %vm364_vm11, %v363_v55, %v357_v56  ;;  %v393_v58 = vrot.slane %v391_v53, 1  ;;  %v396_v59 = vrot.slane %v394_v54, 2  ;;  %v1451_v53 = vld [vmem:[%s1787_s2 + $0x48] sm:$0xff]  }
 0x1e7   : > { %v398_v60 = vshrl.u32 %v368_v57, 16  ;;  %v401_v61 = vshll.u32 %v368_v57, 16 }
 0x1e8   : > { %v397_v0 = vor.u32 %v396_v59, %v393_v58  ;;  %v1452_v59 = vld [vmem:[%s1787_s2 + $0x40] sm:$0xff]  }
 0x1e9   : > { %v400_v62 = vrot.slane %v398_v60, 1  ;;  %v403_v63 = vrot.slane %v401_v61, 2 }
 0x1eb   : > { %v404_v2 = vor.u32 %v403_v63, %v400_v62 }
 0x1ed   : > { %v405_v3 = vsel %vm390_vm12, %v397_v0, %v404_v2 }
 0x1ee   : > { %1356 = vmatmul.mubr.msk.bf16.vlgmr.msra.gmra.mxu1 %vm442_vm13, %v405_v3 }
 0x1ef   : > { %1403 = vmatprep.mubr.msk.bf16.mxu1 %vm1512_vm1, %v1511_v1 }
 0x2ae   : > { %v480_v5 = vpop.f32.mrf.mxu1 }
 0x2af   : > { %v481_v6 = vadd.f32 %v1200_v4, %v480_v5 }
 0x2b0   : > { %v1357_v7 = vpop.f32.mrf.mxu1 }
 0x2b1   : > { %v1208_v8 = vmul.f32 -1.442695, %v481_v6 }
 0x2b2   : > { %v483_v9 = vpop.f32.mrf.mxu1 }
 0x2b3   : > { %1467 = vpow2.f32 %v1208_v8  ;;  %v484_v10 = vadd.f32 %v1200_v4, %v483_v9 }
 0x2b4   : > { %v1358_v11 = vpop.f32.mrf.mxu1 }
 0x2b5   : > { %v1209_v13 = vmul.f32 -1.442695, %v484_v10 }
 0x2b7   : > { %1469 = vpow2.f32 %v1209_v13 }
 0x2c0   : > { %v1468_v14 = vpop.eup %1467 }
 0x2c1   : > { %v495_v15 = vadd.f32 1.0, %v1468_v14 }
 0x2c3   : > { %1471 = vrcp.f32 %v495_v15 }
 0x2c4   : > { %v1470_v16 = vpop.eup %1469 }
 0x2c5   : > { %v496_v19 = vadd.f32 1.0, %v1470_v16  ;;  %v1238_v16 = vld [vmem:[%s1788_s3 + $0x2] ss:$0 sm:$0xff] }
 0x2c7   : > { %1473 = vrcp.f32 %v496_v19 }
 0x2c8   : > { %1475 = vtanh.f32 %v481_v6 }
 0x2c9   : > { %1477 = vtanh.f32 %v484_v10 }
 0x2d0   : > { %v1472_v22 = vpop.eup %1471 }
 0x2d1   : > { %503 = vrot.lane.b32.xlu1 %v1472_v22, %s1516_s21 }
 0x2d4   : > { %v1474_v23 = vpop.eup %1473 }
 0x2d5   : > { %505 = vrot.lane.b32.xlu1 %v1474_v23, %s1516_s21  ;;  %v1476_v25 = vpop.eup %1475 }
 0x2d6   : > { %v1478_v26 = vpop.eup %1477 }
 0x343   : > { %v504_v24 = vpop.permute.xlu1 %503 }
 0x344   : > { %v509_v28 = vmul.f32 %v1476_v25, %v504_v24 }
 0x347   : > { %v506_v27 = vpop.permute.xlu1 %505 }
 0x348   : > { %v510_v29 = vmul.f32 %v1478_v26, %v506_v27 }
 0x34a   : > { %v511_v30 = vpack.c.bf16 %v510_v29, %v509_v28 }
 0x34c   : > { %1364 = vmatmul.mubr.msk.bf16.vlgmr.msra.gmra.mxu0 %vm358_vm10, %v511_v30  ;;  %v1453_v30 = vld [vmem:[%s1787_s2 + $0x78] sm:$0xff]  }
 0x34d   : > { %1379 = vmatprep.mubr.msk.bf16.mxu0 %vm1512_vm1, %v1511_v1  ;;  %1368 = vmatpush3.bf16.msra.mxu0 %v1445_v31 }
 0x34e   : > { %1369 = vmatprep.subr.bf16.mxu0 %v1511_v1 }
 0x351   : > { %1370 = vmatpush3.bf16.msra.mxu0 %v1446_v32  ;;  %v1454_v32 = vld [vmem:[%s1787_s2 + $0x70] sm:$0xff]  }
 0x352   : > { %1371 = vmatprep.subr.bf16.mxu0 %v1511_v1 }
 0x355   : > { %1372 = vmatpush3.bf16.msra.mxu0 %v1448_v47  ;;  %v1461_v47 = vld [vmem:[%s1787_s2 + $0x90] sm:$0xff]  }
 0x356   : > { %1373 = vmatprep.subr.bf16.mxu0 %v1511_v1 }
 0x359   : > { %1374 = vmatpush3.bf16.msra.mxu0 %v1450_v48  ;;  %v1462_v48 = vld [vmem:[%s1787_s2 + $0x88] sm:$0xff]  }
 0x35a   : > { %1375 = vmatprep.subr.bf16.mxu0 %v1511_v1 }
 0x35d   : > { %1376 = vmatpush3.bf16.msra.mxu0 %v1451_v53 }
 0x35e   : > { %1377 = vmatprep.subr.bf16.mxu0 %v1511_v1 }
 0x361   : > { %1378 = vmatpush3.bf16.msra.mxu0 %v1452_v59 }
 0x362   : > { %1383 = vmatprep.subr.bf16.mxu0 %v1511_v1 }
 0x40c   : > { %v566_v34 = vpop.f32.mrf.mxu0 }
 0x40d   : > { %v1656_v35 = vadd.f32 %v1210_v33, %v566_v34 }
 0x40e   : > { %v1365_v36 = vpop.f32.mrf.mxu0 }
 0x40f   : > { %v1297_v37 = vpack.c.bf16 %v1656_v35, %v1656_v35 }
 0x410   : > { %v569_v38 = vpop.f32.mrf.mxu0 }
 0x411   : > { %v581_v39 = vrot.slane %v1297_v37, 6  ;;  %v1660_v40 = vadd.f32 %v1210_v33, %v569_v38 }
 0x412   : > { %v1366_v41 = vpop.f32.mrf.mxu0 }
 0x413   : > { %589 = vst.msk [vmem:[#allocation2] sm:$0xc] %vm306_vm4, %v581_v39  ;;  %v1298_v42 = vpack.c.bf16 %v1660_v40, %v1660_v40  ;;  %v582_v43 = vrot.slane %v581_v39, 4 }
 0x415   : > { %v583_v44 = vrot.slane %v1298_v42, 6 }
 0x417   : > { %v584_v45 = vsel %vm1593_vm6, %v582_v43, %v583_v44  ;;  %v585_v46 = vrot.slane %v583_v44, 4  ;;  %v1458_v44 = vld [vmem:[%s1787_s2 + $0xa8] sm:$0xff]  }
 0x418   : > { %590 = vst.msk [vmem:[#allocation2 + $0x4] sm:$0xf] %vm230_vm2, %v584_v45  ;;  %1392 = vmatpush3.bf16.msra.mxu1 %v1458_v44  ;;  %v1459_v45 = vld [vmem:[%s1787_s2 + $0xa0] sm:$0xff]  }
 0x419   : > { %591 = vst.msk [vmem:[#allocation2 + $0x8] sm:$0x3] %vm309_vm7, %v585_v46  ;;  %1393 = vmatprep.subr.bf16.mxu1 %v1511_v1  ;;  %v1460_v46 = vld [vmem:[%s1787_s2 + $0x98] sm:$0xff]  }
 0x41a   : > { %v595_v50 = vld [vmem:[#allocation2] sm:$0xc] }
 0x41b   : > { %v597_v55 = vld [vmem:[#allocation2] sm:$0x8] }
 0x41c   : > { %v592_v3 = vld [vmem:[#allocation2] sm:$0xe]  ;;  %1394 = vmatpush3.bf16.msra.mxu1 %v1459_v45 }
 0x41d   : > { %1395 = vmatprep.subr.bf16.mxu1 %v1511_v1 }
 0x41f   : > { %v593_v49 = vld [vmem:[#allocation2 + $0x4] sm:$0xf] }
 0x420   : > { %v1441_v51 = vld [vmem:[#allocation2 + $0x8] ss:$0 sps:$4 sm:$0x33]   ;;  %v1218_v52 = vcombine.low %v595_v50, %v593_v49  ;;  %v1220_v57 = vcombine.low %v597_v55, %v593_v49  ;;  %v1216_v4 = vcombine.low %v592_v3, %v593_v49  ;;  %1396 = vmatpush3.bf16.msra.mxu1 %v1460_v46  ;;  %v1248_v49 = vld [vmem:[%s1788_s3 + $0x5] ss:$0 sm:$0xff] }
 0x421   : > { %v614_v54 = vrot.slane %v1441_v51, 1  ;;  %v1444_v58 = vld [vmem:[#allocation2 + $0x8] ss:$0 sps:$4 sm:$0x77]   ;;  %1397 = vmatprep.subr.bf16.mxu1 %v1511_v1  ;;  %v573_v51 = vadd.f32 %v1656_v35, %v1583_v12 }
 0x422   : > { %v613_v56 = vrot.slane %v1218_v52, 1  ;;  %v627_v61 = vrot.slane %v1220_v57, 2  ;;  %v628_v62 = vrot.slane %v1444_v58, 2  ;;  %v1447_v6 = vld [vmem:[#allocation2 + $0x8] ss:$0 sps:$4 sm:$0x11]   ;;  %v574_v57 = vadd.f32 %v1660_v40, %v1587_v17 }
 0x423   : > { %618 = vrot.lane.b32.xlu1 %v614_v54, %s1515_s12  ;;  %v1464_v17 = vld [vmem:[%s1787_s2 + $0x80] sm:$0xff]  }
 0x424   : > { %v615_v60 = vsel %vm350_vm8, %v613_v56, %v614_v54  ;;  %v629_v63 = vsel %vm626_vm14, %v627_v61, %v628_v62  ;;  %1398 = vmatpush3.bf16.msra.mxu1 %v1461_v47 }
 0x425   : > { %1399 = vmatprep.subr.bf16.mxu1 %v1511_v1 }
 0x427   : > { %616 = vrot.lane.b32.xlu1 %v615_v60, %s1515_s12 }
 0x428   : > { %1400 = vmatpush3.bf16.msra.mxu1 %v1462_v48 }
 0x429   : > { %1401 = vmatprep.subr.bf16.mxu1 %v1511_v1 }
 0x42b   : > { %630 = vrot.lane.b32.xlu1 %v629_v63, %s1514_s11 }
 0x42c   : > { %1402 = vmatpush3.bf16.msra.mxu1 %v1464_v17 }
 0x42f   : > { %632 = vrot.lane.b32.xlu1 %v628_v62, %s1514_s11 }
 0x495   : > { %v619_v0 = vpop.permute.xlu1 %618 }
 0x496   : > { %v639_v9 = vsel %vm358_vm10, %v1447_v6, %v619_v0 }
 0x499   : > { %v617_v2 = vpop.permute.xlu1 %616 }
 0x49a   : > { %v636_v7 = vsel %vm358_vm10, %v1216_v4, %v617_v2 }
 0x49d   : > { %v631_v5 = vpop.permute.xlu1 %630 }
 0x49e   : > { %v641_v8 = vsel %vm364_vm11, %v636_v7, %v631_v5 }
 0x49f   : > { %v668_v13 = vrot.slane %v641_v8, 1 }
 0x4a1   : > { %v633_v10 = vpop.permute.xlu1 %632 }
 0x4a2   : > { %v643_v11 = vsel %vm364_vm11, %v639_v9, %v633_v10 }
 0x4a3   : > { %v669_v14 = vrot.slane %v643_v11, 1 }
 0x4a5   : > { %v670_v15 = vsel %vm350_vm8, %v668_v13, %v669_v14 }
 0x4a6   : > { %1380 = vmatmul.mubr.msk.bf16.vlgmr.msra.gmra.mxu0 %vm442_vm13, %v670_v15 }
 0x4a7   : > { %1387 = vmatprep.mubr.msk.bf16.mxu0 %vm1512_vm1, %v1511_v1  ;;  %1384 = vmatpush3.bf16.msra.mxu0 %v1453_v30  ;;  %v1465_v30 = vld [vmem:[%s1787_s2 + $0xb8] sm:$0xff]  }
 0x4a8   : > { %1385 = vmatprep.subr.bf16.mxu0 %v1511_v1 }
 0x4ab   : > { %1386 = vmatpush3.bf16.msra.mxu0 %v1454_v32  ;;  %v1466_v32 = vld [vmem:[%s1787_s2 + $0xb0] sm:$0xff]  }
 0x4ac   : > { %1407 = vmatprep.subr.bf16.mxu0 %v1511_v1 }
 0x566   : > { %v744_v18 = vpop.f32.mrf.mxu0 }
 0x567   : > { %v745_v19 = vadd.f32 %v1238_v16, %v744_v18 }
 0x568   : > { %v1381_v21 = vpop.f32.mrf.mxu0 }
 0x569   : > { %v1246_v22 = vmul.f32 -1.442695, %v745_v19 }
 0x56a   : > { %v747_v23 = vpop.f32.mrf.mxu0 }
 0x56b   : > { %1479 = vpow2.f32 %v1246_v22  ;;  %v748_v24 = vadd.f32 %v1238_v16, %v747_v23  ;;  %v1274_v16 = vld [vmem:[%s1788_s3 + $0x3] ss:$0 sm:$0xff] }
 0x56c   : > { %v1382_v25 = vpop.f32.mrf.mxu0 }
 0x56d   : > { %v1247_v26 = vmul.f32 -1.442695, %v748_v24 }
 0x56f   : > { %1481 = vpow2.f32 %v1247_v26 }
 0x578   : > { %v1480_v27 = vpop.eup %1479 }
 0x579   : > { %v759_v28 = vadd.f32 1.0, %v1480_v27 }
 0x57b   : > { %1483 = vrcp.f32 %v759_v28 }
 0x57c   : > { %v1482_v29 = vpop.eup %1481 }
 0x57d   : > { %v760_v31 = vadd.f32 1.0, %v1482_v29 }
 0x57f   : > { %1485 = vrcp.f32 %v760_v31 }
 0x580   : > { %1487 = vtanh.f32 %v745_v19 }
 0x581   : > { %1489 = vtanh.f32 %v748_v24 }
 0x588   : > { %v1484_v33 = vpop.eup %1483 }
 0x589   : > { %767 = vrot.lane.b32.xlu1 %v1484_v33, %s1516_s21 }
 0x58c   : > { %v1486_v34 = vpop.eup %1485 }
 0x58d   : > { %769 = vrot.lane.b32.xlu1 %v1486_v34, %s1516_s21  ;;  %v1488_v37 = vpop.eup %1487 }
 0x58e   : > { %v1490_v38 = vpop.eup %1489 }
 0x5fb   : > { %v768_v36 = vpop.permute.xlu1 %767 }
 0x5fc   : > { %v773_v41 = vmul.f32 %v1488_v37, %v768_v36 }
 0x5ff   : > { %v770_v39 = vpop.permute.xlu1 %769 }
 0x600   : > { %v774_v42 = vmul.f32 %v1490_v38, %v770_v39 }
 0x602   : > { %v775_v43 = vpack.c.bf16 %v774_v42, %v773_v41 }
 0x604   : > { %1388 = vmatmul.mubr.msk.bf16.vlgmr.msra.gmra.mxu0 %vm358_vm10, %v775_v43  ;;  %v1284_v43 = vld [vmem:[%s1788_s3 + $0x6] ss:$0 sm:$0xff] }
 0x605   : > { %1411 = vmatprep.mubr.msk.bf16.mxu0 %vm1512_vm1, %v1511_v1  ;;  %1408 = vmatpush3.bf16.msra.mxu0 %v1465_v30 }
 0x606   : > { %1409 = vmatprep.subr.bf16.mxu0 %v1511_v1 }
 0x609   : > { %1410 = vmatpush3.bf16.msra.mxu0 %v1466_v32 }
 0x6c4   : > { %v830_v50 = vpop.f32.mrf.mxu0 }
 0x6c5   : > { %v831_v52 = vadd.f32 %v1248_v49, %v830_v50 }
 0x6c6   : > { %v1389_v53 = vpop.f32.mrf.mxu0 }
 0x6c7   : > { %v1740_v54 = vadd.f32 %v831_v52, %v573_v51  ;;  %v1299_v55 = vpack.c.bf16 %v831_v52, %v831_v52 }
 0x6c8   : > { %v833_v56 = vpop.f32.mrf.mxu0 }
 0x6c9   : > { %v845_v58 = vrot.slane %v1299_v55, 6  ;;  %v834_v59 = vadd.f32 %v1248_v49, %v833_v56 }
 0x6ca   : > { %v1390_v60 = vpop.f32.mrf.mxu0 }
 0x6cb   : > { %853 = vst.msk [vmem:[#allocation2] sm:$0xc] %vm306_vm4, %v845_v58  ;;  %v1745_v61 = vadd.f32 %v834_v59, %v574_v57  ;;  %v1300_v62 = vpack.c.bf16 %v834_v59, %v834_v59  ;;  %v846_v63 = vrot.slane %v845_v58, 4 }
 0x6cd   : > { %v847_v0 = vrot.slane %v1300_v62, 6 }
 0x6cf   : > { %v848_v12 = vsel %vm1593_vm6, %v846_v63, %v847_v0  ;;  %v849_v35 = vrot.slane %v847_v0, 4 }
 0x6d0   : > { %854 = vst.msk [vmem:[#allocation2 + $0x4] sm:$0xf] %vm230_vm2, %v848_v12 }
 0x6d1   : > { %855 = vst.msk [vmem:[#allocation2 + $0x8] sm:$0x3] %vm309_vm7, %v849_v35 }
 0x6d2   : > { %v858_v2 = vld [vmem:[#allocation2] sm:$0xc] }
 0x6d3   : > { %v856_v10 = vld [vmem:[#allocation2] sm:$0xf] }
 0x6d7   : > { %v857_v40 = vld [vmem:[#allocation2 + $0x4] sm:$0xf] }
 0x6d8   : > { %v1255_v3 = vcombine.low %v858_v2, %v857_v40  ;;  %v1456_v4 = vld [vmem:[#allocation2 + $0x8] ss:$0 sps:$4 sm:$0x33]   ;;  %v1254_v11 = vcombine.low %v856_v10, %v857_v40 }
 0x6d9   : > { %v873_v6 = vrot.slane %v1456_v4, 2  ;;  %v860_v20 = vld [vmem:[#allocation2 + $0x8] sm:$0xf] }
 0x6da   : > { %v872_v5 = vrot.slane %v1255_v3, 2  ;;  %v1257_v8 = vcombine.low %v857_v40, %v860_v20 }
 0x6dc   : > { %v874_v7 = vsel %vm626_vm14, %v872_v5, %v873_v6 }
 0x6dd   : > { %875 = vrot.lane.b32.xlu1 %v874_v7, %s1515_s12 }
 0x6e1   : > { %880 = vrot.lane.b32.xlu1 %v1257_v8, %s1514_s11 }
 0x74f   : > { %v876_v9 = vpop.permute.xlu1 %875 }
 0x750   : > { %v884_v13 = vsel %vm358_vm10, %v1254_v11, %v876_v9 }
 0x753   : > { %v881_v14 = vpop.permute.xlu1 %880 }
 0x754   : > { %v886_v15 = vsel %vm364_vm11, %v884_v13, %v881_v14 }
 0x755   : > { %1404 = vmatmul.mubr.msk.bf16.vlgmr.msra.gmra.mxu1 %vm442_vm13, %v886_v15 }
 0x815   : > { %v981_v18 = vpop.f32.mrf.mxu1 }
 0x816   : > { %v982_v19 = vadd.f32 %v1274_v16, %v981_v18 }
 0x817   : > { %v1405_v21 = vpop.f32.mrf.mxu1 }
 0x818   : > { %v1282_v22 = vmul.f32 -1.442695, %v982_v19 }
 0x819   : > { %v984_v23 = vpop.f32.mrf.mxu1 }
 0x81a   : > { %1491 = vpow2.f32 %v1282_v22  ;;  %v985_v24 = vadd.f32 %v1274_v16, %v984_v23 }
 0x81b   : > { %v1406_v25 = vpop.f32.mrf.mxu1 }
 0x81c   : > { %v1283_v26 = vmul.f32 -1.442695, %v985_v24 }
 0x81e   : > { %1493 = vpow2.f32 %v1283_v26 }
 0x827   : > { %v1492_v27 = vpop.eup %1491 }
 0x828   : > { %v996_v28 = vadd.f32 1.0, %v1492_v27 }
 0x82a   : > { %1495 = vrcp.f32 %v996_v28 }
 0x82b   : > { %v1494_v29 = vpop.eup %1493 }
 0x82c   : > { %v997_v31 = vadd.f32 1.0, %v1494_v29 }
 0x82e   : > { %1497 = vrcp.f32 %v997_v31 }
 0x82f   : > { %1499 = vtanh.f32 %v982_v19 }
 0x830   : > { %1501 = vtanh.f32 %v985_v24 }
 0x837   : > { %v1496_v33 = vpop.eup %1495 }
 0x838   : > { %1004 = vrot.lane.b32.xlu0 %v1496_v33, %s1516_s21 }
 0x83b   : > { %v1498_v34 = vpop.eup %1497 }
 0x83c   : > { %1006 = vrot.lane.b32.xlu1 %v1498_v34, %s1516_s21  ;;  %v1500_v37 = vpop.eup %1499  ;;  %s1294_s21 = sshll.u32 %s1793_s16, 4 }
 0x83d   : > { %v1502_v38 = vpop.eup %1501  ;;  %s194_s22 = scalar_lea.vmem %s1789_s4, %s1294_s21 }
 0x8aa   : > { %v1005_v36 = vpop.permute.xlu0 %1004 }
 0x8ab   : > { %v1010_v41 = vmul.f32 %v1500_v37, %v1005_v36 }
 0x8ae   : > { %v1007_v39 = vpop.permute.xlu1 %1006 }
 0x8af   : > { %v1011_v1 = vmul.f32 %v1502_v38, %v1007_v39 }
 0x8b1   : > { %v1012_v42 = vpack.c.bf16 %v1011_v1, %v1010_v41 }
 0x8b3   : > { %1412 = vmatmul.mubr.msk.bf16.vlgmr.msra.gmra.mxu0 %vm358_vm10, %v1012_v42 }
 0x973   : > { %v1067_v44 = vpop.f32.mrf.mxu0 }
 0x974   : > { %v1068_v45 = vadd.f32 %v1284_v43, %v1067_v44 }
 0x975   : > { %v1413_v46 = vpop.f32.mrf.mxu0 }
 0x976   : > { %v1074_v47 = vadd.f32 %v1068_v45, %v1740_v54 }
 0x977   : > { %v1070_v48 = vpop.f32.mrf.mxu0 }
 0x978   : > { %v1071_v49 = vadd.f32 %v1284_v43, %v1070_v48  ;;  %1076 = vxpose.xlu0.b32.start [1/2] (short) (narrow) %v1074_v47, 32 }
 0x979   : > { %v1414_v50 = vpop.f32.mrf.mxu0 }
 0x97a   : > { %v1075_v51 = vadd.f32 %v1071_v49, %v1745_v61 }
 0x97c   : > { %1077 = vxpose.xlu0.b32.end [2/2] (short) (narrow) %v1075_v51, 32 }
 0x9f4   : > { %v1092_v52 = vpop.trf.xlu0 }
 0x9f5   : > { %v1301_v53 = vpack.c.bf16 %v1092_v52, %v1092_v52 }
 0x9f7   : > { %1125 = vst.msk [vmem:[%s194_s22] sm:$0xf] %vm1124_vm15, %v1301_v53 }
 0x9f8   : > { %v1093_v55 = vpop.trf.xlu0 }
 0x9f9   : > { %v1302_v56 = vpack.c.bf16 %v1093_v55, %v1093_v55 }
 0x9fb   : > { %1126 = vst.msk [vmem:[%s194_s22 + $0x4] sm:$0xf] %vm1124_vm15, %v1302_v56 }
 0x9fc   : > { %v1094_v54 = vpop.trf.xlu0 }
 0x9fd   : > { %v1303_v57 = vpack.c.bf16 %v1094_v54, %v1094_v54 }
 0x9ff   : > { %1127 = vst.msk [vmem:[%s194_s22 + $0x8] sm:$0xf] %vm1124_vm15, %v1303_v57 }
 0xa00   : > { %v1095_v58 = vpop.trf.xlu0 }
 0xa01   : > { %v1304_v59 = vpack.c.bf16 %v1095_v58, %v1095_v58 }
 0xa03   : > { %1128 = vst.msk [vmem:[%s194_s22 + $0xc] sm:$0xf] %vm1124_vm15, %v1304_v59 }
 0xa04 PF: > { %s14_s15 = sadd.s32 1, %s1509_s15  }
 0xa05   : > { %p11_p4 = scmp.ge.s32.totalorder %s14_s15, 4  }
 0xa07   :  { %13 = sbr.rel (!%p11_p4) target bundleno = 1 (0x1), region = 68 }

// kernel: tpu_custom_call.1
= control target key start
LH: loop header
LB: loop body
LE: loop exit
PB: predicated region body
PF: predicated region fallthrough
CT: control target
= control target key end

     0   :  { %s1542_s15 = smov 0   ;;  %s1785_s0 = inlined_call_operand.vmem [shape: f32[2,4,16], index: 0, kind: input, shape index: {}]   ;;  %s1786_s1 = inlined_call_operand.vmem [shape: bf16[4,32], index: 1, kind: input, shape index: {}]   ;;  %s1787_s2 = inlined_call_operand.vmem [shape: bf16[3,128,64], index: 2, kind: input, shape index: {}]   ;;  %s1788_s3 = inlined_call_operand.vmem [shape: f32[7,64], index: 3, kind: input, shape index: {}]   ;;  %s1789_s4 = inlined_call_operand.vmem [shape: bf16[2,32,16], index: 4, kind: output, shape index: {}]  }
   0x1 LB: > { %s1184_s16 = sadd.s32 4294967295, %s1509_s15   ;;  %p1188_p0 = scmp.ge.s32.totalorder %s1509_s15, 1  ;;  %s1509_s15 = sphi %s1542_s15, %s14_s15  }
   0x2   : > { %p161_p1 = scmp.lt.s32.totalorder %s1509_s15, 3 }
   0x4   : > { %p162_p2 = pnand %p1188_p0, %p161_p1 }
   0x5   : > { %p186_p3 = scmp.lt.s32.totalorder (!%p162_p2), %s1184_s16, 1  ;;  %s1514_s11 = smov (!%p162_p2), 64  }
   0x6   : > { %165 = sbr.rel (%p162_p2) target bundleno = 2564 (0xa04), region = 36  ;;  %s1515_s12 = smov (!%p162_p2), 32  }
   0x7   : > { %s1516_s21 = smov (!%p162_p2), 96  }
   0xb   : > { %s1793_s16 = smov (!%p186_p3, %s1184_s16), 1  ;;  %v234_v0 = vld [vmem:[%s1786_s1] sm:$0x3]  ;;  %vm244_vm0 = vcmask 1041408   ;;  %v1511_v1 = vmov 0.0   ;;  %vm1512_vm1 = vmmov 0  }
   0xc   : > { %s1189_s19 = sshll.u32 %s1793_s16, 2  ;;  %1337 = vmatprep.subr.bf16.mxu0 %v1511_v1  ;;  %v246_v2 = vsel %vm244_vm0, %v234_v0, 0  ;;  %1343 = vmatprep.subr.bf16.mxu1 %v1511_v1  ;;  %vm230_vm2 = vcmask 257024   ;;  %v1513_v4 = vmov 0   ;;  %vm240_vm3 = vcmask 31744   ;;  %v1432_v8 = vld [vmem:[%s1787_s2 + $0x28] sm:$0xff]  }
   0xd   : > { %s189_s22 = scalar_lea.vmem %s1785_s0, %s1189_s19  ;;  %1338 = vmatpush3.bf16.msra.mxu0 %v246_v2  ;;  %1339 = vmatprep.mubr.msk.bf16.mxu0 %vm1512_vm1, %v1511_v1  ;;  %231 = vst.msk [vmem:[#allocation2] sm:$0xf] %vm230_vm2, %v1513_v4  ;;  %232 = vst.msk [vmem:[#allocation2 + $0x4] sm:$0xf] %vm230_vm2, %v1513_v4  ;;  %v1433_v9 = vld [vmem:[%s1787_s2 + $0x20] sm:$0xff]   ;;  %vm306_vm4 = vcmask 257026  }
   0xe   : > { %v196_v3 = vld [vmem:[%s189_s22] sm:$0xf]  ;;  %1359 = vmatprep.subr.bf16.mxu0 %v1511_v1  ;;  %1355 = vmatprep.mubr.msk.bf16.mxu1 %vm1512_vm1, %v1511_v1  ;;  %233 = vst.msk [vmem:[#allocation2 + $0x8] sm:$0xf] %vm230_vm2, %v1513_v4  ;;  %vm296_vm5 = vcmask 1045508   ;;  %vm309_vm7 = vcmask 254976  }
   0xf   : > { %197 = vxpose.xlu0.b32.start.end [1/1] (short) (narrow) %v196_v3, 16  ;;  %1344 = vmatpush3.bf16.msra.mxu1 %v1432_v8  ;;  %v1192_v10 = vld [vmem:[%s1788_s3] ss:$0 sm:$0xff]  ;;  %vm1593_vm6 = vmor %vm244_vm0, %vm296_vm5  ;;  %v1434_v25 = vld [vmem:[%s1787_s2 + $0x18] sm:$0xff]   ;;  %vm350_vm8 = vcmask 1046528   ;;  %vm358_vm10 = vcmask 261120  }
  0x10   : > { %1345 = vmatprep.subr.bf16.mxu1 %v1511_v1  ;;  %v1436_v26 = vld [vmem:[%s1787_s2 + $0x10] sm:$0xff]   ;;  %v1437_v31 = vld [vmem:[%s1787_s2 + $0x8] sm:$0xff]   ;;  %v1438_v40 = vld [vmem:[%s1787_s2] sm:$0xff]   ;;  %vm327_vm9 = vsmask.f32 7424  ;;  %vm364_vm11 = vcmask 523264  }
  0x11   : > { %vm390_vm12 = vsmask.f32 6400  ;;  %vm442_vm13 = vcmask 785408   ;;  %v1200_v4 = vld [vmem:[%s1788_s3 + $0x1] ss:$0 sm:$0xff]  ;;  %vm626_vm14 = vcmask 1045504  }
  0x12   : > { %vm1124_vm15 = vcmask 125952  }
  0x13   : > { %1346 = vmatpush3.bf16.msra.mxu1 %v1433_v9 }
  0x14   : > { %1347 = vmatprep.subr.bf16.mxu1 %v1511_v1 }
  0x17   : > { %1348 = vmatpush3.bf16.msra.mxu1 %v1434_v25 }
  0x18   : > { %1349 = vmatprep.subr.bf16.mxu1 %v1511_v1 }
  0x1b   : > { %1350 = vmatpush3.bf16.msra.mxu1 %v1436_v26 }
  0x1c   : > { %1351 = vmatprep.subr.bf16.mxu1 %v1511_v1 }
  0x1f   : > { %1352 = vmatpush3.bf16.msra.mxu1 %v1437_v31  ;;  %v1445_v31 = vld [vmem:[%s1787_s2 + $0x68] sm:$0xff]  }
  0x20   : > { %1353 = vmatprep.subr.bf16.mxu1 %v1511_v1 }
  0x23   : > { %1354 = vmatpush3.bf16.msra.mxu1 %v1438_v40 }
  0x24   : > { %1391 = vmatprep.subr.bf16.mxu1 %v1511_v1 }
  0x8b   : > { %v213_v5 = vpop.trf.xlu0 }
  0x8f   : > { %v214_v6 = vpop.trf.xlu0 }
  0x90   : > { %v229_v7 = vpack.c.bf16 %v214_v6, %v213_v5 }
  0x92   : > { %1340 = vmatmul.mubr.msk.bf16.vlgmr.msra.gmra.mxu0 %vm240_vm3, %v229_v7 }
  0x93   : > { %1363 = vmatprep.mubr.msk.bf16.mxu0 %vm1512_vm1, %v1511_v1 }
 0x152   : > { %v282_v11 = vpop.f32.mrf.mxu0 }
 0x153   : > { %v1583_v12 = vadd.f32 %v1192_v10, %v282_v11 }
 0x154   : > { %v1341_v13 = vpop.f32.mrf.mxu0 }
 0x155   : > { %v1295_v14 = vpack.c.bf16 %v1583_v12, %v1583_v12 }
 0x156   : > { %v285_v15 = vpop.f32.mrf.mxu0 }
 0x157   : > { %v298_v16 = vrot.slane %v1295_v14, 6  ;;  %v1587_v17 = vadd.f32 %v1192_v10, %v285_v15 }
 0x158   : > { %v1342_v18 = vpop.f32.mrf.mxu0 }
 0x159   : > { %307 = vst.msk [vmem:[#allocation2] sm:$0xc] %vm306_vm4, %v298_v16  ;;  %v1296_v19 = vpack.c.bf16 %v1587_v17, %v1587_v17  ;;  %v299_v21 = vrot.slane %v298_v16, 4  ;;  %v1439_v18 = vld [vmem:[%s1787_s2 + $0x38] sm:$0xff]  }
 0x15a   : > { %1360 = vmatpush3.bf16.msra.mxu0 %v1439_v18 }
 0x15b   : > { %v300_v22 = vrot.slane %v1296_v19, 6  ;;  %1361 = vmatprep.subr.bf16.mxu0 %v1511_v1 }
 0x15d   : > { %v301_v23 = vsel %vm1593_vm6, %v299_v21, %v300_v22  ;;  %v302_v24 = vrot.slane %v300_v22, 4  ;;  %v1440_v21 = vld [vmem:[%s1787_s2 + $0x30] sm:$0xff]  }
 0x15e   : > { %308 = vst.msk [vmem:[#allocation2 + $0x4] sm:$0xf] %vm230_vm2, %v301_v23  ;;  %1362 = vmatpush3.bf16.msra.mxu0 %v1440_v21 }
 0x15f   : > { %310 = vst.msk [vmem:[#allocation2 + $0x8] sm:$0x3] %vm309_vm7, %v302_v24  ;;  %1367 = vmatprep.subr.bf16.mxu0 %v1511_v1 }
 0x160   : > { %v314_v28 = vld [vmem:[#allocation2] sm:$0xc] }
 0x161   : > { %v311_v47 = vld [vmem:[#allocation2] sm:$0xe] }
 0x165   : > { %v312_v27 = vld [vmem:[#allocation2 + $0x4] sm:$0xf] }
 0x166   : > { %v1198_v29 = vcombine.low %v314_v28, %v312_v27  ;;  %v1430_v30 = vld [vmem:[#allocation2 + $0x8] ss:$0 sps:$4 sm:$0x77]   ;;  %v1196_v48 = vcombine.low %v311_v47, %v312_v27  ;;  %v1448_v47 = vld [vmem:[%s1787_s2 + $0x58] sm:$0xff]  }
 0x167   : > { %v1431_v32 = vld [vmem:[#allocation2 + $0x8] ss:$0 sps:$4 sm:$0x33]   ;;  %v352_v34 = vrot.slane %v1430_v30, 1 }
 0x168   : > { %v351_v33 = vrot.slane %v1198_v29, 1  ;;  %v331_v35 = vshll.u32 %v1198_v29, 16  ;;  %v336_v36 = vshll.u32 %v1431_v32, 16  ;;  %v329_v38 = vshrl.u32 %v1198_v29, 16 }
 0x169   : > { %v340_v42 = vshrl.u32 %v1431_v32, 16 }
 0x16a   : > { %v353_v37 = vsel %vm350_vm8, %v351_v33, %v352_v34  ;;  %v333_v39 = vrot.slane %v331_v35, 1  ;;  %v338_v41 = vrot.slane %v336_v36, 1  ;;  %v1210_v33 = vld [vmem:[%s1788_s3 + $0x4] ss:$0 sm:$0xff] }
 0x16b   : > { %354 = vrot.lane.b32.xlu1 %v353_v37, %s1514_s11 }
 0x16c   : > { %v334_v43 = vor.u32 %v333_v39, %v329_v38  ;;  %v342_v44 = vor.u32 %v340_v42, %v338_v41 }
 0x16e   : > { %v339_v45 = vsel %vm327_vm9, %v334_v43, %v338_v41 }
 0x16f   : > { %343 = vrot.lane.b32.xlu0 %v339_v45, %s1515_s12  ;;  %345 = vrot.lane.b32.xlu1 %v342_v44, %s1515_s12 }
 0x173   : > { %356 = vrot.lane.b32.xlu1 %v352_v34, %s1514_s11 }
 0x1dd   : > { %v355_v46 = vpop.permute.xlu1 %354 }
 0x1e1   : > { %v344_v49 = vpop.permute.xlu0 %343  ;;  %v346_v50 = vpop.permute.xlu1 %345 }
 0x1e2   : > { %v361_v51 = vsel %vm358_vm10, %v1196_v48, %v344_v49  ;;  %v363_v55 = vsel %vm358_vm10, %v1431_v32, %v346_v50  ;;  %v1446_v32 = vld [vmem:[%s1787_s2 + $0x60] sm:$0xff]   ;;  %v1450_v48 = vld [vmem:[%s1787_s2 + $0x50] sm:$0xff]  }
 0x1e3   : > { %v366_v52 = vsel %vm364_vm11, %v361_v51, %v355_v46 }
 0x1e4   : > { %v391_v53 = vshrl.u32 %v366_v52, 16  ;;  %v394_v54 = vshll.u32 %v366_v52, 16 }
 0x1e5   : > { %v357_v56 = vpop.permute.xlu1 %356 }
 0x1e6   : > { %v368_v57 = vsel %vm364_vm11, %v363_v55, %v357_v56  ;;  %v393_v58 = vrot.slane %v391_v53, 1  ;;  %v396_v59 = vrot.slane %v394_v54, 2  ;;  %v1451_v53 = vld [vmem:[%s1787_s2 + $0x48] sm:$0xff]  }
 0x1e7   : > { %v398_v60 = vshrl.u32 %v368_v57, 16  ;;  %v401_v61 = vshll.u32 %v368_v57, 16 }
 0x1e8   : > { %v397_v0 = vor.u32 %v396_v59, %v393_v58  ;;  %v1452_v59 = vld [vmem:[%s1787_s2 + $0x40] sm:$0xff]  }
 0x1e9   : > { %v400_v62 = vrot.slane %v398_v60, 1  ;;  %v403_v63 = vrot.slane %v401_v61, 2 }
 0x1eb   : > { %v404_v2 = vor.u32 %v403_v63, %v400_v62 }
 0x1ed   : > { %v405_v3 = vsel %vm390_vm12, %v397_v0, %v404_v2 }
 0x1ee   : > { %1356 = vmatmul.mubr.msk.bf16.vlgmr.msra.gmra.mxu1 %vm442_vm13, %v405_v3 }
 0x1ef   : > { %1403 = vmatprep.mubr.msk.bf16.mxu1 %vm1512_vm1, %v1511_v1 }
 0x2ae   : > { %v480_v5 = vpop.f32.mrf.mxu1 }
 0x2af   : > { %v481_v6 = vadd.f32 %v1200_v4, %v480_v5 }
 0x2b0   : > { %v1357_v7 = vpop.f32.mrf.mxu1 }
 0x2b1   : > { %v1208_v8 = vmul.f32 -1.442695, %v481_v6 }
 0x2b2   : > { %v483_v9 = vpop.f32.mrf.mxu1 }
 0x2b3   : > { %1467 = vpow2.f32 %v1208_v8  ;;  %v484_v10 = vadd.f32 %v1200_v4, %v483_v9 }
 0x2b4   : > { %v1358_v11 = vpop.f32.mrf.mxu1 }
 0x2b5   : > { %v1209_v13 = vmul.f32 -1.442695, %v484_v10 }
 0x2b7   : > { %1469 = vpow2.f32 %v1209_v13 }
 0x2c0   : > { %v1468_v14 = vpop.eup %1467 }
 0x2c1   : > { %v495_v15 = vadd.f32 1.0, %v1468_v14 }
 0x2c3   : > { %1471 = vrcp.f32 %v495_v15 }
 0x2c4   : > { %v1470_v16 = vpop.eup %1469 }
 0x2c5   : > { %v496_v19 = vadd.f32 1.0, %v1470_v16  ;;  %v1238_v16 = vld [vmem:[%s1788_s3 + $0x2] ss:$0 sm:$0xff] }
 0x2c7   : > { %1473 = vrcp.f32 %v496_v19 }
 0x2c8   : > { %1475 = vtanh.f32 %v481_v6 }
 0x2c9   : > { %1477 = vtanh.f32 %v484_v10 }
 0x2d0   : > { %v1472_v22 = vpop.eup %1471 }
 0x2d1   : > { %503 = vrot.lane.b32.xlu1 %v1472_v22, %s1516_s21 }
 0x2d4   : > { %v1474_v23 = vpop.eup %1473 }
 0x2d5   : > { %505 = vrot.lane.b32.xlu1 %v1474_v23, %s1516_s21  ;;  %v1476_v25 = vpop.eup %1475 }
 0x2d6   : > { %v1478_v26 = vpop.eup %1477 }
 0x343   : > { %v504_v24 = vpop.permute.xlu1 %503 }
 0x344   : > { %v509_v28 = vmul.f32 %v1476_v25, %v504_v24 }
 0x347   : > { %v506_v27 = vpop.permute.xlu1 %505 }
 0x348   : > { %v510_v29 = vmul.f32 %v1478_v26, %v506_v27 }
 0x34a   : > { %v511_v30 = vpack.c.bf16 %v510_v29, %v509_v28 }
 0x34c   : > { %1364 = vmatmul.mubr.msk.bf16.vlgmr.msra.gmra.mxu0 %vm358_vm10, %v511_v30  ;;  %v1453_v30 = vld [vmem:[%s1787_s2 + $0x78] sm:$0xff]  }
 0x34d   : > { %1379 = vmatprep.mubr.msk.bf16.mxu0 %vm1512_vm1, %v1511_v1  ;;  %1368 = vmatpush3.bf16.msra.mxu0 %v1445_v31 }
 0x34e   : > { %1369 = vmatprep.subr.bf16.mxu0 %v1511_v1 }
 0x351   : > { %1370 = vmatpush3.bf16.msra.mxu0 %v1446_v32  ;;  %v1454_v32 = vld [vmem:[%s1787_s2 + $0x70] sm:$0xff]  }
 0x352   : > { %1371 = vmatprep.subr.bf16.mxu0 %v1511_v1 }
 0x355   : > { %1372 = vmatpush3.bf16.msra.mxu0 %v1448_v47  ;;  %v1461_v47 = vld [vmem:[%s1787_s2 + $0x90] sm:$0xff]  }
 0x356   : > { %1373 = vmatprep.subr.bf16.mxu0 %v1511_v1 }
 0x359   : > { %1374 = vmatpush3.bf16.msra.mxu0 %v1450_v48  ;;  %v1462_v48 = vld [vmem:[%s1787_s2 + $0x88] sm:$0xff]  }
 0x35a   : > { %1375 = vmatprep.subr.bf16.mxu0 %v1511_v1 }
 0x35d   : > { %1376 = vmatpush3.bf16.msra.mxu0 %v1451_v53 }
 0x35e   : > { %1377 = vmatprep.subr.bf16.mxu0 %v1511_v1 }
 0x361   : > { %1378 = vmatpush3.bf16.msra.mxu0 %v1452_v59 }
 0x362   : > { %1383 = vmatprep.subr.bf16.mxu0 %v1511_v1 }
 0x40c   : > { %v566_v34 = vpop.f32.mrf.mxu0 }
 0x40d   : > { %v1656_v35 = vadd.f32 %v1210_v33, %v566_v34 }
 0x40e   : > { %v1365_v36 = vpop.f32.mrf.mxu0 }
 0x40f   : > { %v1297_v37 = vpack.c.bf16 %v1656_v35, %v1656_v35 }
 0x410   : > { %v569_v38 = vpop.f32.mrf.mxu0 }
 0x411   : > { %v581_v39 = vrot.slane %v1297_v37, 6  ;;  %v1660_v40 = vadd.f32 %v1210_v33, %v569_v38 }
 0x412   : > { %v1366_v41 = vpop.f32.mrf.mxu0 }
 0x413   : > { %589 = vst.msk [vmem:[#allocation2] sm:$0xc] %vm306_vm4, %v581_v39  ;;  %v1298_v42 = vpack.c.bf16 %v1660_v40, %v1660_v40  ;;  %v582_v43 = vrot.slane %v581_v39, 4 }
 0x415   : > { %v583_v44 = vrot.slane %v1298_v42, 6 }
 0x417   : > { %v584_v45 = vsel %vm1593_vm6, %v582_v43, %v583_v44  ;;  %v585_v46 = vrot.slane %v583_v44, 4  ;;  %v1458_v44 = vld [vmem:[%s1787_s2 + $0xa8] sm:$0xff]  }
 0x418   : > { %590 = vst.msk [vmem:[#allocation2 + $0x4] sm:$0xf] %vm230_vm2, %v584_v45  ;;  %1392 = vmatpush3.bf16.msra.mxu1 %v1458_v44  ;;  %v1459_v45 = vld [vmem:[%s1787_s2 + $0xa0] sm:$0xff]  }
 0x419   : > { %591 = vst.msk [vmem:[#allocation2 + $0x8] sm:$0x3] %vm309_vm7, %v585_v46  ;;  %1393 = vmatprep.subr.bf16.mxu1 %v1511_v1  ;;  %v1460_v46 = vld [vmem:[%s1787_s2 + $0x98] sm:$0xff]  }
 0x41a   : > { %v595_v50 = vld [vmem:[#allocation2] sm:$0xc] }
 0x41b   : > { %v597_v55 = vld [vmem:[#allocation2] sm:$0x8] }
 0x41c   : > { %v592_v3 = vld [vmem:[#allocation2] sm:$0xe]  ;;  %1394 = vmatpush3.bf16.msra.mxu1 %v1459_v45 }
 0x41d   : > { %1395 = vmatprep.subr.bf16.mxu1 %v1511_v1 }
 0x41f   : > { %v593_v49 = vld [vmem:[#allocation2 + $0x4] sm:$0xf] }
 0x420   : > { %v1441_v51 = vld [vmem:[#allocation2 + $0x8] ss:$0 sps:$4 sm:$0x33]   ;;  %v1218_v52 = vcombine.low %v595_v50, %v593_v49  ;;  %v1220_v57 = vcombine.low %v597_v55, %v593_v49  ;;  %v1216_v4 = vcombine.low %v592_v3, %v593_v49  ;;  %1396 = vmatpush3.bf16.msra.mxu1 %v1460_v46  ;;  %v1248_v49 = vld [vmem:[%s1788_s3 + $0x5] ss:$0 sm:$0xff] }
 0x421   : > { %v614_v54 = vrot.slane %v1441_v51, 1  ;;  %v1444_v58 = vld [vmem:[#allocation2 + $0x8] ss:$0 sps:$4 sm:$0x77]   ;;  %1397 = vmatprep.subr.bf16.mxu1 %v1511_v1  ;;  %v573_v51 = vadd.f32 %v1656_v35, %v1583_v12 }
 0x422   : > { %v613_v56 = vrot.slane %v1218_v52, 1  ;;  %v627_v61 = vrot.slane %v1220_v57, 2  ;;  %v628_v62 = vrot.slane %v1444_v58, 2  ;;  %v1447_v6 = vld [vmem:[#allocation2 + $0x8] ss:$0 sps:$4 sm:$0x11]   ;;  %v574_v57 = vadd.f32 %v1660_v40, %v1587_v17 }
 0x423   : > { %618 = vrot.lane.b32.xlu1 %v614_v54, %s1515_s12  ;;  %v1464_v17 = vld [vmem:[%s1787_s2 + $0x80] sm:$0xff]  }
 0x424   : > { %v615_v60 = vsel %vm350_vm8, %v613_v56, %v614_v54  ;;  %v629_v63 = vsel %vm626_vm14, %v627_v61, %v628_v62  ;;  %1398 = vmatpush3.bf16.msra.mxu1 %v1461_v47 }
 0x425   : > { %1399 = vmatprep.subr.bf16.mxu1 %v1511_v1 }
 0x427   : > { %616 = vrot.lane.b32.xlu1 %v615_v60, %s1515_s12 }
 0x428   : > { %1400 = vmatpush3.bf16.msra.mxu1 %v1462_v48 }
 0x429   : > { %1401 = vmatprep.subr.bf16.mxu1 %v1511_v1 }
 0x42b   : > { %630 = vrot.lane.b32.xlu1 %v629_v63, %s1514_s11 }
 0x42c   : > { %1402 = vmatpush3.bf16.msra.mxu1 %v1464_v17 }
 0x42f   : > { %632 = vrot.lane.b32.xlu1 %v628_v62, %s1514_s11 }
 0x495   : > { %v619_v0 = vpop.permute.xlu1 %618 }
 0x496   : > { %v639_v9 = vsel %vm358_vm10, %v1447_v6, %v619_v0 }
 0x499   : > { %v617_v2 = vpop.permute.xlu1 %616 }
 0x49a   : > { %v636_v7 = vsel %vm358_vm10, %v1216_v4, %v617_v2 }
 0x49d   : > { %v631_v5 = vpop.permute.xlu1 %630 }
 0x49e   : > { %v641_v8 = vsel %vm364_vm11, %v636_v7, %v631_v5 }
 0x49f   : > { %v668_v13 = vrot.slane %v641_v8, 1 }
 0x4a1   : > { %v633_v10 = vpop.permute.xlu1 %632 }
 0x4a2   : > { %v643_v11 = vsel %vm364_vm11, %v639_v9, %v633_v10 }
 0x4a3   : > { %v669_v14 = vrot.slane %v643_v11, 1 }
 0x4a5   : > { %v670_v15 = vsel %vm350_vm8, %v668_v13, %v669_v14 }
 0x4a6   : > { %1380 = vmatmul.mubr.msk.bf16.vlgmr.msra.gmra.mxu0 %vm442_vm13, %v670_v15 }
 0x4a7   : > { %1387 = vmatprep.mubr.msk.bf16.mxu0 %vm1512_vm1, %v1511_v1  ;;  %1384 = vmatpush3.bf16.msra.mxu0 %v1453_v30  ;;  %v1465_v30 = vld [vmem:[%s1787_s2 + $0xb8] sm:$0xff]  }
 0x4a8   : > { %1385 = vmatprep.subr.bf16.mxu0 %v1511_v1 }
 0x4ab   : > { %1386 = vmatpush3.bf16.msra.mxu0 %v1454_v32  ;;  %v1466_v32 = vld [vmem:[%s1787_s2 + $0xb0] sm:$0xff]  }
 0x4ac   : > { %1407 = vmatprep.subr.bf16.mxu0 %v1511_v1 }
 0x566   : > { %v744_v18 = vpop.f32.mrf.mxu0 }
 0x567   : > { %v745_v19 = vadd.f32 %v1238_v16, %v744_v18 }
 0x568   : > { %v1381_v21 = vpop.f32.mrf.mxu0 }
 0x569   : > { %v1246_v22 = vmul.f32 -1.442695, %v745_v19 }
 0x56a   : > { %v747_v23 = vpop.f32.mrf.mxu0 }
 0x56b   : > { %1479 = vpow2.f32 %v1246_v22  ;;  %v748_v24 = vadd.f32 %v1238_v16, %v747_v23  ;;  %v1274_v16 = vld [vmem:[%s1788_s3 + $0x3] ss:$0 sm:$0xff] }
 0x56c   : > { %v1382_v25 = vpop.f32.mrf.mxu0 }
 0x56d   : > { %v1247_v26 = vmul.f32 -1.442695, %v748_v24 }
 0x56f   : > { %1481 = vpow2.f32 %v1247_v26 }
 0x578   : > { %v1480_v27 = vpop.eup %1479 }
 0x579   : > { %v759_v28 = vadd.f32 1.0, %v1480_v27 }
 0x57b   : > { %1483 = vrcp.f32 %v759_v28 }
 0x57c   : > { %v1482_v29 = vpop.eup %1481 }
 0x57d   : > { %v760_v31 = vadd.f32 1.0, %v1482_v29 }
 0x57f   : > { %1485 = vrcp.f32 %v760_v31 }
 0x580   : > { %1487 = vtanh.f32 %v745_v19 }
 0x581   : > { %1489 = vtanh.f32 %v748_v24 }
 0x588   : > { %v1484_v33 = vpop.eup %1483 }
 0x589   : > { %767 = vrot.lane.b32.xlu1 %v1484_v33, %s1516_s21 }
 0x58c   : > { %v1486_v34 = vpop.eup %1485 }
 0x58d   : > { %769 = vrot.lane.b32.xlu1 %v1486_v34, %s1516_s21  ;;  %v1488_v37 = vpop.eup %1487 }
 0x58e   : > { %v1490_v38 = vpop.eup %1489 }
 0x5fb   : > { %v768_v36 = vpop.permute.xlu1 %767 }
 0x5fc   : > { %v773_v41 = vmul.f32 %v1488_v37, %v768_v36 }
 0x5ff   : > { %v770_v39 = vpop.permute.xlu1 %769 }
 0x600   : > { %v774_v42 = vmul.f32 %v1490_v38, %v770_v39 }
 0x602   : > { %v775_v43 = vpack.c.bf16 %v774_v42, %v773_v41 }
 0x604   : > { %1388 = vmatmul.mubr.msk.bf16.vlgmr.msra.gmra.mxu0 %vm358_vm10, %v775_v43  ;;  %v1284_v43 = vld [vmem:[%s1788_s3 + $0x6] ss:$0 sm:$0xff] }
 0x605   : > { %1411 = vmatprep.mubr.msk.bf16.mxu0 %vm1512_vm1, %v1511_v1  ;;  %1408 = vmatpush3.bf16.msra.mxu0 %v1465_v30 }
 0x606   : > { %1409 = vmatprep.subr.bf16.mxu0 %v1511_v1 }
 0x609   : > { %1410 = vmatpush3.bf16.msra.mxu0 %v1466_v32 }
 0x6c4   : > { %v830_v50 = vpop.f32.mrf.mxu0 }
 0x6c5   : > { %v831_v52 = vadd.f32 %v1248_v49, %v830_v50 }
 0x6c6   : > { %v1389_v53 = vpop.f32.mrf.mxu0 }
 0x6c7   : > { %v1740_v54 = vadd.f32 %v831_v52, %v573_v51  ;;  %v1299_v55 = vpack.c.bf16 %v831_v52, %v831_v52 }
 0x6c8   : > { %v833_v56 = vpop.f32.mrf.mxu0 }
 0x6c9   : > { %v845_v58 = vrot.slane %v1299_v55, 6  ;;  %v834_v59 = vadd.f32 %v1248_v49, %v833_v56 }
 0x6ca   : > { %v1390_v60 = vpop.f32.mrf.mxu0 }
 0x6cb   : > { %853 = vst.msk [vmem:[#allocation2] sm:$0xc] %vm306_vm4, %v845_v58  ;;  %v1745_v61 = vadd.f32 %v834_v59, %v574_v57  ;;  %v1300_v62 = vpack.c.bf16 %v834_v59, %v834_v59  ;;  %v846_v63 = vrot.slane %v845_v58, 4 }
 0x6cd   : > { %v847_v0 = vrot.slane %v1300_v62, 6 }
 0x6cf   : > { %v848_v12 = vsel %vm1593_vm6, %v846_v63, %v847_v0  ;;  %v849_v35 = vrot.slane %v847_v0, 4 }
 0x6d0   : > { %854 = vst.msk [vmem:[#allocation2 + $0x4] sm:$0xf] %vm230_vm2, %v848_v12 }
 0x6d1   : > { %855 = vst.msk [vmem:[#allocation2 + $0x8] sm:$0x3] %vm309_vm7, %v849_v35 }
 0x6d2   : > { %v858_v2 = vld [vmem:[#allocation2] sm:$0xc] }
 0x6d3   : > { %v856_v10 = vld [vmem:[#allocation2] sm:$0xf] }
 0x6d7   : > { %v857_v40 = vld [vmem:[#allocation2 + $0x4] sm:$0xf] }
 0x6d8   : > { %v1255_v3 = vcombine.low %v858_v2, %v857_v40  ;;  %v1456_v4 = vld [vmem:[#allocation2 + $0x8] ss:$0 sps:$4 sm:$0x33]   ;;  %v1254_v11 = vcombine.low %v856_v10, %v857_v40 }
 0x6d9   : > { %v873_v6 = vrot.slane %v1456_v4, 2  ;;  %v860_v20 = vld [vmem:[#allocation2 + $0x8] sm:$0xf] }
 0x6da   : > { %v872_v5 = vrot.slane %v1255_v3, 2  ;;  %v1257_v8 = vcombine.low %v857_v40, %v860_v20 }
 0x6dc   : > { %v874_v7 = vsel %vm626_vm14, %v872_v5, %v873_v6 }
 0x6dd   : > { %875 = vrot.lane.b32.xlu1 %v874_v7, %s1515_s12 }
 0x6e1   : > { %880 = vrot.lane.b32.xlu1 %v1257_v8, %s1514_s11 }
 0x74f   : > { %v876_v9 = vpop.permute.xlu1 %875 }
 0x750   : > { %v884_v13 = vsel %vm358_vm10, %v1254_v11, %v876_v9 }
 0x753   : > { %v881_v14 = vpop.permute.xlu1 %880 }
 0x754   : > { %v886_v15 = vsel %vm364_vm11, %v884_v13, %v881_v14 }
 0x755   : > { %1404 = vmatmul.mubr.msk.bf16.vlgmr.msra.gmra.mxu1 %vm442_vm13, %v886_v15 }
 0x815   : > { %v981_v18 = vpop.f32.mrf.mxu1 }
 0x816   : > { %v982_v19 = vadd.f32 %v1274_v16, %v981_v18 }
 0x817   : > { %v1405_v21 = vpop.f32.mrf.mxu1 }
 0x818   : > { %v1282_v22 = vmul.f32 -1.442695, %v982_v19 }
 0x819   : > { %v984_v23 = vpop.f32.mrf.mxu1 }
 0x81a   : > { %1491 = vpow2.f32 %v1282_v22  ;;  %v985_v24 = vadd.f32 %v1274_v16, %v984_v23 }
 0x81b   : > { %v1406_v25 = vpop.f32.mrf.mxu1 }
 0x81c   : > { %v1283_v26 = vmul.f32 -1.442695, %v985_v24 }
 0x81e   : > { %1493 = vpow2.f32 %v1283_v26 }
 0x827   : > { %v1492_v27 = vpop.eup %1491 }
 0x828   : > { %v996_v28 = vadd.f32 1.0, %v1492_v27 }
 0x82a   : > { %1495 = vrcp.f32 %v996_v28 }
 0x82b   : > { %v1494_v29 = vpop.eup %1493 }
 0x82c   : > { %v997_v31 = vadd.f32 1.0, %v1494_v29 }
 0x82e   : > { %1497 = vrcp.f32 %v997_v31 }
 0x82f   : > { %1499 = vtanh.f32 %v982_v19 }
 0x830   : > { %1501 = vtanh.f32 %v985_v24 }
 0x837   : > { %v1496_v33 = vpop.eup %1495 }
 0x838   : > { %1004 = vrot.lane.b32.xlu0 %v1496_v33, %s1516_s21 }
 0x83b   : > { %v1498_v34 = vpop.eup %1497 }
 0x83c   : > { %1006 = vrot.lane.b32.xlu1 %v1498_v34, %s1516_s21  ;;  %v1500_v37 = vpop.eup %1499  ;;  %s1294_s21 = sshll.u32 %s1793_s16, 4 }
 0x83d   : > { %v1502_v38 = vpop.eup %1501  ;;  %s194_s22 = scalar_lea.vmem %s1789_s4, %s1294_s21 }
 0x8aa   : > { %v1005_v36 = vpop.permute.xlu0 %1004 }
 0x8ab   : > { %v1010_v41 = vmul.f32 %v1500_v37, %v1005_v36 }
 0x8ae   : > { %v1007_v39 = vpop.permute.xlu1 %1006 }
 0x8af   : > { %v1011_v1 = vmul.f32 %v1502_v38, %v1007_v39 }
 0x8b1   : > { %v1012_v42 = vpack.c.bf16 %v1011_v1, %v1010_v41 }
 0x8b3   : > { %1412 = vmatmul.mubr.msk.bf16.vlgmr.msra.gmra.mxu0 %vm358_vm10, %v1012_v42 }
 0x973   : > { %v1067_v44 = vpop.f32.mrf.mxu0 }
 0x974   : > { %v1068_v45 = vadd.f32 %v1284_v43, %v1067_v44 }
 0x975   : > { %v1413_v46 = vpop.f32.mrf.mxu0 }
 0x976   : > { %v1074_v47 = vadd.f32 %v1068_v45, %v1740_v54 }
 0x977   : > { %v1070_v48 = vpop.f32.mrf.mxu0 }
 0x978   : > { %v1071_v49 = vadd.f32 %v1284_v43, %v1070_v48  ;;  %1076 = vxpose.xlu0.b32.start [1/2] (short) (narrow) %v1074_v47, 32 }
 0x979   : > { %v1414_v50 = vpop.f32.mrf.mxu0 }
 0x97a   : > { %v1075_v51 = vadd.f32 %v1071_v49, %v1745_v61 }
 0x97c   : > { %1077 = vxpose.xlu0.b32.end [2/2] (short) (narrow) %v1075_v51, 32 }
 0x9f4   : > { %v1092_v52 = vpop.trf.xlu0 }
 0x9f5   : > { %v1301_v53 = vpack.c.bf16 %v1092_v52, %v1092_v52 }
 0x9f7   : > { %1125 = vst.msk [vmem:[%s194_s22] sm:$0xf] %vm1124_vm15, %v1301_v53 }
 0x9f8   : > { %v1093_v55 = vpop.trf.xlu0 }
 0x9f9   : > { %v1302_v56 = vpack.c.bf16 %v1093_v55, %v1093_v55 }
 0x9fb   : > { %1126 = vst.msk [vmem:[%s194_s22 + $0x4] sm:$0xf] %vm1124_vm15, %v1302_v56 }
 0x9fc   : > { %v1094_v54 = vpop.trf.xlu0 }
 0x9fd   : > { %v1303_v57 = vpack.c.bf16 %v1094_v54, %v1094_v54 }
 0x9ff   : > { %1127 = vst.msk [vmem:[%s194_s22 + $0x8] sm:$0xf] %vm1124_vm15, %v1303_v57 }
 0xa00   : > { %v1095_v58 = vpop.trf.xlu0 }
 0xa01   : > { %v1304_v59 = vpack.c.bf16 %v1095_v58, %v1095_v58 }
 0xa03   : > { %1128 = vst.msk [vmem:[%s194_s22 + $0xc] sm:$0xf] %vm1124_vm15, %v1304_v59 }
 0xa04 PF: > { %s14_s15 = sadd.s32 1, %s1509_s15  }
 0xa05   : > { %p11_p4 = scmp.ge.s32.totalorder %s14_s15, 4  }
 0xa07   :  { %13 = sbr.rel (!%p11_p4) target bundleno = 1 (0x1), region = 68 }

</bundles_post_ra>
